<compile_context>
chip_gen: v5e
topology: v5e:2x2
jax: 0.10.0
libtpu: 0.0.40
codegen_flags: <defaults>
</compile_context>

<pallas_src>
import functools

import jax
import jax.numpy as jnp
from jax.experimental import pallas as pl
from jax.experimental.pallas import tpu as pltpu


# ------------------------------ fused kernel --------------------------------

def _jsccq_fused_kernel(
    embed_ref,       # SMEM (K, 2)   codebook rows (re, im)
    chan_ref,        # SMEM (1, 1)   10^(-snr/10) / 2
    img_r_ref,       # VMEM (Cin, M) even-W plane of the input image
    img_i_ref,       # VMEM (Cin, M) odd-W plane
    w_enc_ref,       # VMEM (Cf, Cin)
    b_enc_ref,       # VMEM (Cf, 1)
    w_dec_ref,       # VMEM (Cout, Cf)
    b_dec_ref,       # VMEM (Cout, 1)
    noise_r_ref,     # VMEM (Cf, M)  standard-normal noise, re components
    noise_i_ref,     # VMEM (Cf, M)  standard-normal noise, im components
    out_r_ref,       # VMEM (Cout, M)
    out_i_ref,       # VMEM (Cout, M)
    lik_ref,         # VMEM (1, K)
    *, sigma, n_embed, inv_n,
):
    f32 = jnp.float32

    # -------- encoder: 1x1 conv as lane-dense (Cf, M) = W(Cf,Cin) @ X(Cin,M) --
    xr = jnp.dot(w_enc_ref[...], img_r_ref[...],
                 preferred_element_type=f32) + b_enc_ref[...]
    xi = jnp.dot(w_enc_ref[...], img_i_ref[...],
                 preferred_element_type=f32) + b_enc_ref[...]

    # -------- soft/hard vector quantization (VPU broadcast math, no MXU) -----
    # logits[k] = -sigma * ((xr - er_k)^2 + (xi - ei_k)^2)
    logits = []
    for k in range(n_embed):
        er = embed_ref[k, 0]
        ei = embed_ref[k, 1]
        dr = xr - er
        di = xi - ei
        logits.append(-sigma * (dr * dr + di * di))

    # running max + first-max argmax (softmax is monotone, so this matches
    # torch.argmax(soft_assign, 1))
    best = logits[0]
    idx = jnp.zeros(best.shape, dtype=jnp.int32)
    for k in range(1, n_embed):
        take = logits[k] > best
        best = jnp.where(take, logits[k], best)
        idx = jnp.where(take, k, idx)

    # softmax numerators / denominator
    ps = [jnp.exp(l - best) for l in logits]
    denom = ps[0]
    for k in range(1, n_embed):
        denom = denom + ps[k]
    inv_denom = pl.reciprocal(denom, approx=True)      # EUP slot, ~free

    # likelihoods[k] = mean over the N symbols of softmax(-sigma*dist)[:, k]
    w_lik = inv_denom * inv_n
    lane_iota = jax.lax.broadcasted_iota(jnp.int32, (1, n_embed), 1)
    lik = jnp.zeros((1, n_embed), dtype=f32)
    for k in range(n_embed):
        lik = lik + jnp.where(lane_iota == k, jnp.sum(ps[k] * w_lik), 0.0)
    lik_ref[...] = lik

    # hard assignment (forward value of the straight-through estimator).
    # TODO(synk): straight-through gradients (soft path) would need a
    # jax.custom_vjp around this pallas_call; this kernel is forward-only.
    qr = jnp.zeros_like(xr)
    qi = jnp.zeros_like(xi)
    for k in range(n_embed):
        sel = idx == k
        qr = jnp.where(sel, embed_ref[k, 0], qr)
        qi = jnp.where(sel, embed_ref[k, 1], qi)

    # -------- AWGN channel (fused; Es never leaves the kernel) ---------------
    es = jnp.sum(qr * qr + qi * qi) * inv_n            # mean |symbol|^2
    noise_pwr = jnp.sqrt(es * chan_ref[0, 0])          # sqrt(Es * 10^(-snr/10)/2)
    yr = qr + noise_pwr * noise_r_ref[...]
    yi = qi + noise_pwr * noise_i_ref[...]

    # -------- decoder: 1x1 conv + sigmoid, lane-dense output -----------------
    zr = jnp.dot(w_dec_ref[...], yr, preferred_element_type=f32) + b_dec_ref[...]
    zi = jnp.dot(w_dec_ref[...], yi, preferred_element_type=f32) + b_dec_ref[...]
    out_r_ref[...] = jax.nn.sigmoid(zr)
    out_i_ref[...] = jax.nn.sigmoid(zi)


# ------------------------------ JAX wrapper ----------------------------------

def jsccq_forward(img, snr, params, *, sigma, noise_key):
    """Mirrors JSCCQ.forward: enc -> quantize -> AWGN channel -> dec -> sigmoid.

    enc/dec (externally supplied modules in the original) are modeled as 1x1
    convolutions; since they are pointwise in space, the even/odd-W plane
    split below reproduces torch's consecutive-W complex pairing exactly.
    """
    B, Cin, H, W = img.shape
    assert W % 2 == 0, "W must be even so complex pairs do not straddle rows"
    Cf = params["enc_w"].shape[0]
    Cout = params["dec_w"].shape[0]
    K = params["embed"].shape[0]
    M = B * H * (W // 2)          # batch*spatial positions per plane (lane axis)
    N = Cf * M                    # number of complex symbols

    # De-interleave even/odd W columns -> lane-dense (Cin, M) planes.  Tiny
    # layout plumbing in the wrapper; all heavy work stays inside the kernel.
    img5 = img.reshape(B, Cin, H, W // 2, 2)
    planes = jnp.transpose(img5, (4, 1, 0, 2, 3)).reshape(2, Cin, M)

    # Pre-sampled N(0,1) channel noise (scaled by noise_pwr inside the kernel).
    # TODO(synk): torch.randn_like uses torch's RNG stream; we sample the same
    # distribution with a fixed JAX key for determinism.
    noise = jax.random.normal(noise_key, (2, Cf, M), dtype=jnp.float32)

    chan = (10.0 ** (-jnp.asarray(snr, jnp.float32) / 10.0) / 2.0).reshape(1, 1)

    kernel = functools.partial(
        _jsccq_fused_kernel, sigma=float(sigma), n_embed=K, inv_n=1.0 / N)

    out_r, out_i, lik = pl.pallas_call(
        kernel,
        out_shape=(
            jax.ShapeDtypeStruct((Cout, M), jnp.float32),
            jax.ShapeDtypeStruct((Cout, M), jnp.float32),
            jax.ShapeDtypeStruct((1, K), jnp.float32),
        ),
        grid=(1,),
        in_specs=[
            pl.BlockSpec(memory_space=pltpu.MemorySpace.SMEM),   # embed (K,2)
            pl.BlockSpec(memory_space=pltpu.MemorySpace.SMEM),   # chan factor
            pl.BlockSpec((Cin, M), lambda i: (0, 0)),            # img_r
            pl.BlockSpec((Cin, M), lambda i: (0, 0)),            # img_i
            pl.BlockSpec((Cf, Cin), lambda i: (0, 0)),           # w_enc
            pl.BlockSpec((Cf, 1), lambda i: (0, 0)),             # b_enc
            pl.BlockSpec((Cout, Cf), lambda i: (0, 0)),          # w_dec
            pl.BlockSpec((Cout, 1), lambda i: (0, 0)),           # b_dec
            pl.BlockSpec((Cf, M), lambda i: (0, 0)),             # noise_r
            pl.BlockSpec((Cf, M), lambda i: (0, 0)),             # noise_i
        ],
        out_specs=(
            pl.BlockSpec((Cout, M), lambda i: (0, 0)),
            pl.BlockSpec((Cout, M), lambda i: (0, 0)),
            pl.BlockSpec((1, K), lambda i: (0, 0)),
        ),
        compiler_params=pltpu.CompilerParams(dimension_semantics=("arbitrary",)),
    )(params["embed"], chan, planes[0], planes[1],
      params["enc_w"], params["enc_b"], params["dec_w"], params["dec_b"],
      noise[0], noise[1])

    # Re-interleave the even/odd planes back into NCHW.
    y = jnp.stack([out_r, out_i], axis=-1).reshape(Cout, B, H, W)
    output = jnp.transpose(y, (1, 0, 2, 3))
    likelihoods = lik[0]
    return output, likelihoods


# ---------------------------------- main -------------------------------------

if __name__ == "__main__":
    B, C_IN, H, W = 2, 3, 16, 16
    C_FEAT, C_OUT, N_EMBED = 4, 3, 16
    SIGMA = 1.0          # value self.sigma takes after linear_anneal(t=0), Kg=1
    SNR = 10.0

    key = jax.random.PRNGKey(0)
    k_img, k_ew, k_dw, k_emb, k_noise = jax.random.split(key, 5)

    img = jax.random.normal(k_img, (B, C_IN, H, W), dtype=jnp.float32)

    params = {
        # enc: Conv2d(C_IN, C_FEAT, 1) -> weight (Cout, Cin) for column matmul
        "enc_w": 0.1 * jax.random.normal(k_ew, (C_FEAT, C_IN), dtype=jnp.float32),
        "enc_b": jnp.zeros((C_FEAT, 1), dtype=jnp.float32),
        # dec: Conv2d(C_FEAT, C_OUT, 1)
        "dec_w": 0.1 * jax.random.normal(k_dw, (C_OUT, C_FEAT), dtype=jnp.float32),
        "dec_b": jnp.zeros((C_OUT, 1), dtype=jnp.float32),
        # args['embed']: (n_embed, 2) constellation
        "embed": jax.random.normal(k_emb, (N_EMBED, 2), dtype=jnp.float32),
    }

    output, likelihoods = jsccq_forward(
        img, SNR, params, sigma=SIGMA, noise_key=k_noise)
    jax.block_until_ready((output, likelihoods))

    assert output.shape == (B, C_OUT, H, W)
    assert likelihoods.shape == (N_EMBED,)
    assert bool(jnp.all(jnp.isfinite(output)))
    # softmax rows sum to 1 -> likelihoods (their mean) must sum to ~1
    assert abs(float(jnp.sum(likelihoods)) - 1.0) < 5e-2
    print("KERNEL_OK")
</pallas_src>

<mosaic_0001>
module attributes {stable_mosaic.version = 11 : i64} {
  func.func @_jsccq_fused_kernel(%arg0: i32, %arg1: memref<16x2xf32, #tpu.memory_space<smem>>, %arg2: memref<1x1xf32, #tpu.memory_space<smem>>, %arg3: memref<3x256xf32, #tpu.memory_space<vmem>>, %arg4: memref<3x256xf32, #tpu.memory_space<vmem>>, %arg5: memref<4x3xf32, #tpu.memory_space<vmem>>, %arg6: memref<4x1xf32, #tpu.memory_space<vmem>>, %arg7: memref<3x4xf32, #tpu.memory_space<vmem>>, %arg8: memref<3x1xf32, #tpu.memory_space<vmem>>, %arg9: memref<4x256xf32, #tpu.memory_space<vmem>>, %arg10: memref<4x256xf32, #tpu.memory_space<vmem>>, %arg11: memref<3x256xf32, #tpu.memory_space<vmem>>, %arg12: memref<3x256xf32, #tpu.memory_space<vmem>>, %arg13: memref<1x16xf32, #tpu.memory_space<vmem>>) attributes {dimension_semantics = [#tpu.dimension_semantics<arbitrary>], iteration_bounds = array<i64: 1>, scalar_prefetch = 0 : i64, scratch_operands = 0 : i64, tpu.core_type = #tpu.core_type<tc>, window_params = [{transform_indices = @transform_0, window_bounds = array<i64: 16, 2>}, {transform_indices = @transform_1, window_bounds = array<i64: 1, 1>}, {pipeline_mode = #tpu.pipeline_mode<synchronous>, transform_indices = @transform_2, window_bounds = array<i64: 3, 256>}, {pipeline_mode = #tpu.pipeline_mode<synchronous>, transform_indices = @transform_3, window_bounds = array<i64: 3, 256>}, {pipeline_mode = #tpu.pipeline_mode<synchronous>, transform_indices = @transform_4, window_bounds = array<i64: 4, 3>}, {pipeline_mode = #tpu.pipeline_mode<synchronous>, transform_indices = @transform_5, window_bounds = array<i64: 4, 1>}, {pipeline_mode = #tpu.pipeline_mode<synchronous>, transform_indices = @transform_6, window_bounds = array<i64: 3, 4>}, {pipeline_mode = #tpu.pipeline_mode<synchronous>, transform_indices = @transform_7, window_bounds = array<i64: 3, 1>}, {pipeline_mode = #tpu.pipeline_mode<synchronous>, transform_indices = @transform_8, window_bounds = array<i64: 4, 256>}, {pipeline_mode = #tpu.pipeline_mode<synchronous>, transform_indices = @transform_9, window_bounds = array<i64: 4, 256>}, {pipeline_mode = #tpu.pipeline_mode<synchronous>, transform_indices = @transform_10, window_bounds = array<i64: 3, 256>}, {pipeline_mode = #tpu.pipeline_mode<synchronous>, transform_indices = @transform_11, window_bounds = array<i64: 3, 256>}, {pipeline_mode = #tpu.pipeline_mode<synchronous>, transform_indices = @transform_12, window_bounds = array<i64: 1, 16>}]} {
    %c0 = arith.constant 0 : index
    %c0_0 = arith.constant 0 : index
    %0 = vector.load %arg5[%c0, %c0_0] : memref<4x3xf32, #tpu.memory_space<vmem>>, vector<4x3xf32>
    %c0_1 = arith.constant 0 : index
    %c0_2 = arith.constant 0 : index
    %1 = vector.load %arg3[%c0_1, %c0_2] : memref<3x256xf32, #tpu.memory_space<vmem>>, vector<3x256xf32>
    %cst = arith.constant dense<0.000000e+00> : vector<4x256xf32>
    %2 = tpu.matmul %0, %1, %cst {dimension_numbers = #tpu.dot_dimension_numbers<[1], [0], [0], [1], [0, 0, 1, 1], [], []>} : vector<4x3xf32>, vector<3x256xf32>, vector<4x256xf32> -> vector<4x256xf32>
    %c0_3 = arith.constant 0 : index
    %c0_4 = arith.constant 0 : index
    %3 = vector.load %arg6[%c0_3, %c0_4] : memref<4x1xf32, #tpu.memory_space<vmem>>, vector<4x1xf32>
    %4 = vector.broadcast %3 : vector<4x1xf32> to vector<4x256xf32>
    %5 = arith.addf %2, %4 : vector<4x256xf32>
    %c0_5 = arith.constant 0 : index
    %c0_6 = arith.constant 0 : index
    %6 = vector.load %arg5[%c0_5, %c0_6] : memref<4x3xf32, #tpu.memory_space<vmem>>, vector<4x3xf32>
    %c0_7 = arith.constant 0 : index
    %c0_8 = arith.constant 0 : index
    %7 = vector.load %arg4[%c0_7, %c0_8] : memref<3x256xf32, #tpu.memory_space<vmem>>, vector<3x256xf32>
    %cst_9 = arith.constant dense<0.000000e+00> : vector<4x256xf32>
    %8 = tpu.matmul %6, %7, %cst_9 {dimension_numbers = #tpu.dot_dimension_numbers<[1], [0], [0], [1], [0, 0, 1, 1], [], []>} : vector<4x3xf32>, vector<3x256xf32>, vector<4x256xf32> -> vector<4x256xf32>
    %c0_10 = arith.constant 0 : index
    %c0_11 = arith.constant 0 : index
    %9 = vector.load %arg6[%c0_10, %c0_11] : memref<4x1xf32, #tpu.memory_space<vmem>>, vector<4x1xf32>
    %10 = vector.broadcast %9 : vector<4x1xf32> to vector<4x256xf32>
    %11 = arith.addf %8, %10 : vector<4x256xf32>
    %c0_12 = arith.constant 0 : index
    %c0_13 = arith.constant 0 : index
    %12 = memref.load %arg1[%c0_12, %c0_13] : memref<16x2xf32, #tpu.memory_space<smem>>
    %c0_14 = arith.constant 0 : index
    %c1 = arith.constant 1 : index
    %13 = memref.load %arg1[%c0_14, %c1] : memref<16x2xf32, #tpu.memory_space<smem>>
    %14 = vector.broadcast %12 : f32 to vector<4x256xf32>
    %15 = arith.subf %5, %14 : vector<4x256xf32>
    %16 = vector.broadcast %13 : f32 to vector<4x256xf32>
    %17 = arith.subf %11, %16 : vector<4x256xf32>
    %18 = arith.mulf %15, %15 : vector<4x256xf32>
    %19 = arith.mulf %17, %17 : vector<4x256xf32>
    %20 = arith.addf %18, %19 : vector<4x256xf32>
    %cst_15 = arith.constant -1.000000e+00 : f32
    %21 = vector.broadcast %cst_15 : f32 to vector<4x256xf32>
    %22 = arith.mulf %21, %20 : vector<4x256xf32>
    %c1_16 = arith.constant 1 : index
    %c0_17 = arith.constant 0 : index
    %23 = memref.load %arg1[%c1_16, %c0_17] : memref<16x2xf32, #tpu.memory_space<smem>>
    %c1_18 = arith.constant 1 : index
    %c1_19 = arith.constant 1 : index
    %24 = memref.load %arg1[%c1_18, %c1_19] : memref<16x2xf32, #tpu.memory_space<smem>>
    %25 = vector.broadcast %23 : f32 to vector<4x256xf32>
    %26 = arith.subf %5, %25 : vector<4x256xf32>
    %27 = vector.broadcast %24 : f32 to vector<4x256xf32>
    %28 = arith.subf %11, %27 : vector<4x256xf32>
    %29 = arith.mulf %26, %26 : vector<4x256xf32>
    %30 = arith.mulf %28, %28 : vector<4x256xf32>
    %31 = arith.addf %29, %30 : vector<4x256xf32>
    %cst_20 = arith.constant -1.000000e+00 : f32
    %32 = vector.broadcast %cst_20 : f32 to vector<4x256xf32>
    %33 = arith.mulf %32, %31 : vector<4x256xf32>
    %c2 = arith.constant 2 : index
    %c0_21 = arith.constant 0 : index
    %34 = memref.load %arg1[%c2, %c0_21] : memref<16x2xf32, #tpu.memory_space<smem>>
    %c2_22 = arith.constant 2 : index
    %c1_23 = arith.constant 1 : index
    %35 = memref.load %arg1[%c2_22, %c1_23] : memref<16x2xf32, #tpu.memory_space<smem>>
    %36 = vector.broadcast %34 : f32 to vector<4x256xf32>
    %37 = arith.subf %5, %36 : vector<4x256xf32>
    %38 = vector.broadcast %35 : f32 to vector<4x256xf32>
    %39 = arith.subf %11, %38 : vector<4x256xf32>
    %40 = arith.mulf %37, %37 : vector<4x256xf32>
    %41 = arith.mulf %39, %39 : vector<4x256xf32>
    %42 = arith.addf %40, %41 : vector<4x256xf32>
    %cst_24 = arith.constant -1.000000e+00 : f32
    %43 = vector.broadcast %cst_24 : f32 to vector<4x256xf32>
    %44 = arith.mulf %43, %42 : vector<4x256xf32>
    %c3 = arith.constant 3 : index
    %c0_25 = arith.constant 0 : index
    %45 = memref.load %arg1[%c3, %c0_25] : memref<16x2xf32, #tpu.memory_space<smem>>
    %c3_26 = arith.constant 3 : index
    %c1_27 = arith.constant 1 : index
    %46 = memref.load %arg1[%c3_26, %c1_27] : memref<16x2xf32, #tpu.memory_space<smem>>
    %47 = vector.broadcast %45 : f32 to vector<4x256xf32>
    %48 = arith.subf %5, %47 : vector<4x256xf32>
    %49 = vector.broadcast %46 : f32 to vector<4x256xf32>
    %50 = arith.subf %11, %49 : vector<4x256xf32>
    %51 = arith.mulf %48, %48 : vector<4x256xf32>
    %52 = arith.mulf %50, %50 : vector<4x256xf32>
    %53 = arith.addf %51, %52 : vector<4x256xf32>
    %cst_28 = arith.constant -1.000000e+00 : f32
    %54 = vector.broadcast %cst_28 : f32 to vector<4x256xf32>
    %55 = arith.mulf %54, %53 : vector<4x256xf32>
    %c4 = arith.constant 4 : index
    %c0_29 = arith.constant 0 : index
    %56 = memref.load %arg1[%c4, %c0_29] : memref<16x2xf32, #tpu.memory_space<smem>>
    %c4_30 = arith.constant 4 : index
    %c1_31 = arith.constant 1 : index
    %57 = memref.load %arg1[%c4_30, %c1_31] : memref<16x2xf32, #tpu.memory_space<smem>>
    %58 = vector.broadcast %56 : f32 to vector<4x256xf32>
    %59 = arith.subf %5, %58 : vector<4x256xf32>
    %60 = vector.broadcast %57 : f32 to vector<4x256xf32>
    %61 = arith.subf %11, %60 : vector<4x256xf32>
    %62 = arith.mulf %59, %59 : vector<4x256xf32>
    %63 = arith.mulf %61, %61 : vector<4x256xf32>
    %64 = arith.addf %62, %63 : vector<4x256xf32>
    %cst_32 = arith.constant -1.000000e+00 : f32
    %65 = vector.broadcast %cst_32 : f32 to vector<4x256xf32>
    %66 = arith.mulf %65, %64 : vector<4x256xf32>
    %c5 = arith.constant 5 : index
    %c0_33 = arith.constant 0 : index
    %67 = memref.load %arg1[%c5, %c0_33] : memref<16x2xf32, #tpu.memory_space<smem>>
    %c5_34 = arith.constant 5 : index
    %c1_35 = arith.constant 1 : index
    %68 = memref.load %arg1[%c5_34, %c1_35] : memref<16x2xf32, #tpu.memory_space<smem>>
    %69 = vector.broadcast %67 : f32 to vector<4x256xf32>
    %70 = arith.subf %5, %69 : vector<4x256xf32>
    %71 = vector.broadcast %68 : f32 to vector<4x256xf32>
    %72 = arith.subf %11, %71 : vector<4x256xf32>
    %73 = arith.mulf %70, %70 : vector<4x256xf32>
    %74 = arith.mulf %72, %72 : vector<4x256xf32>
    %75 = arith.addf %73, %74 : vector<4x256xf32>
    %cst_36 = arith.constant -1.000000e+00 : f32
    %76 = vector.broadcast %cst_36 : f32 to vector<4x256xf32>
    %77 = arith.mulf %76, %75 : vector<4x256xf32>
    %c6 = arith.constant 6 : index
    %c0_37 = arith.constant 0 : index
    %78 = memref.load %arg1[%c6, %c0_37] : memref<16x2xf32, #tpu.memory_space<smem>>
    %c6_38 = arith.constant 6 : index
    %c1_39 = arith.constant 1 : index
    %79 = memref.load %arg1[%c6_38, %c1_39] : memref<16x2xf32, #tpu.memory_space<smem>>
    %80 = vector.broadcast %78 : f32 to vector<4x256xf32>
    %81 = arith.subf %5, %80 : vector<4x256xf32>
    %82 = vector.broadcast %79 : f32 to vector<4x256xf32>
    %83 = arith.subf %11, %82 : vector<4x256xf32>
    %84 = arith.mulf %81, %81 : vector<4x256xf32>
    %85 = arith.mulf %83, %83 : vector<4x256xf32>
    %86 = arith.addf %84, %85 : vector<4x256xf32>
    %cst_40 = arith.constant -1.000000e+00 : f32
    %87 = vector.broadcast %cst_40 : f32 to vector<4x256xf32>
    %88 = arith.mulf %87, %86 : vector<4x256xf32>
    %c7 = arith.constant 7 : index
    %c0_41 = arith.constant 0 : index
    %89 = memref.load %arg1[%c7, %c0_41] : memref<16x2xf32, #tpu.memory_space<smem>>
    %c7_42 = arith.constant 7 : index
    %c1_43 = arith.constant 1 : index
    %90 = memref.load %arg1[%c7_42, %c1_43] : memref<16x2xf32, #tpu.memory_space<smem>>
    %91 = vector.broadcast %89 : f32 to vector<4x256xf32>
    %92 = arith.subf %5, %91 : vector<4x256xf32>
    %93 = vector.broadcast %90 : f32 to vector<4x256xf32>
    %94 = arith.subf %11, %93 : vector<4x256xf32>
    %95 = arith.mulf %92, %92 : vector<4x256xf32>
    %96 = arith.mulf %94, %94 : vector<4x256xf32>
    %97 = arith.addf %95, %96 : vector<4x256xf32>
    %cst_44 = arith.constant -1.000000e+00 : f32
    %98 = vector.broadcast %cst_44 : f32 to vector<4x256xf32>
    %99 = arith.mulf %98, %97 : vector<4x256xf32>
    %c8 = arith.constant 8 : index
    %c0_45 = arith.constant 0 : index
    %100 = memref.load %arg1[%c8, %c0_45] : memref<16x2xf32, #tpu.memory_space<smem>>
    %c8_46 = arith.constant 8 : index
    %c1_47 = arith.constant 1 : index
    %101 = memref.load %arg1[%c8_46, %c1_47] : memref<16x2xf32, #tpu.memory_space<smem>>
    %102 = vector.broadcast %100 : f32 to vector<4x256xf32>
    %103 = arith.subf %5, %102 : vector<4x256xf32>
    %104 = vector.broadcast %101 : f32 to vector<4x256xf32>
    %105 = arith.subf %11, %104 : vector<4x256xf32>
    %106 = arith.mulf %103, %103 : vector<4x256xf32>
    %107 = arith.mulf %105, %105 : vector<4x256xf32>
    %108 = arith.addf %106, %107 : vector<4x256xf32>
    %cst_48 = arith.constant -1.000000e+00 : f32
    %109 = vector.broadcast %cst_48 : f32 to vector<4x256xf32>
    %110 = arith.mulf %109, %108 : vector<4x256xf32>
    %c9 = arith.constant 9 : index
    %c0_49 = arith.constant 0 : index
    %111 = memref.load %arg1[%c9, %c0_49] : memref<16x2xf32, #tpu.memory_space<smem>>
    %c9_50 = arith.constant 9 : index
    %c1_51 = arith.constant 1 : index
    %112 = memref.load %arg1[%c9_50, %c1_51] : memref<16x2xf32, #tpu.memory_space<smem>>
    %113 = vector.broadcast %111 : f32 to vector<4x256xf32>
    %114 = arith.subf %5, %113 : vector<4x256xf32>
    %115 = vector.broadcast %112 : f32 to vector<4x256xf32>
    %116 = arith.subf %11, %115 : vector<4x256xf32>
    %117 = arith.mulf %114, %114 : vector<4x256xf32>
    %118 = arith.mulf %116, %116 : vector<4x256xf32>
    %119 = arith.addf %117, %118 : vector<4x256xf32>
    %cst_52 = arith.constant -1.000000e+00 : f32
    %120 = vector.broadcast %cst_52 : f32 to vector<4x256xf32>
    %121 = arith.mulf %120, %119 : vector<4x256xf32>
    %c10 = arith.constant 10 : index
    %c0_53 = arith.constant 0 : index
    %122 = memref.load %arg1[%c10, %c0_53] : memref<16x2xf32, #tpu.memory_space<smem>>
    %c10_54 = arith.constant 10 : index
    %c1_55 = arith.constant 1 : index
    %123 = memref.load %arg1[%c10_54, %c1_55] : memref<16x2xf32, #tpu.memory_space<smem>>
    %124 = vector.broadcast %122 : f32 to vector<4x256xf32>
    %125 = arith.subf %5, %124 : vector<4x256xf32>
    %126 = vector.broadcast %123 : f32 to vector<4x256xf32>
    %127 = arith.subf %11, %126 : vector<4x256xf32>
    %128 = arith.mulf %125, %125 : vector<4x256xf32>
    %129 = arith.mulf %127, %127 : vector<4x256xf32>
    %130 = arith.addf %128, %129 : vector<4x256xf32>
    %cst_56 = arith.constant -1.000000e+00 : f32
    %131 = vector.broadcast %cst_56 : f32 to vector<4x256xf32>
    %132 = arith.mulf %131, %130 : vector<4x256xf32>
    %c11 = arith.constant 11 : index
    %c0_57 = arith.constant 0 : index
    %133 = memref.load %arg1[%c11, %c0_57] : memref<16x2xf32, #tpu.memory_space<smem>>
    %c11_58 = arith.constant 11 : index
    %c1_59 = arith.constant 1 : index
    %134 = memref.load %arg1[%c11_58, %c1_59] : memref<16x2xf32, #tpu.memory_space<smem>>
    %135 = vector.broadcast %133 : f32 to vector<4x256xf32>
    %136 = arith.subf %5, %135 : vector<4x256xf32>
    %137 = vector.broadcast %134 : f32 to vector<4x256xf32>
    %138 = arith.subf %11, %137 : vector<4x256xf32>
    %139 = arith.mulf %136, %136 : vector<4x256xf32>
    %140 = arith.mulf %138, %138 : vector<4x256xf32>
    %141 = arith.addf %139, %140 : vector<4x256xf32>
    %cst_60 = arith.constant -1.000000e+00 : f32
    %142 = vector.broadcast %cst_60 : f32 to vector<4x256xf32>
    %143 = arith.mulf %142, %141 : vector<4x256xf32>
    %c12 = arith.constant 12 : index
    %c0_61 = arith.constant 0 : index
    %144 = memref.load %arg1[%c12, %c0_61] : memref<16x2xf32, #tpu.memory_space<smem>>
    %c12_62 = arith.constant 12 : index
    %c1_63 = arith.constant 1 : index
    %145 = memref.load %arg1[%c12_62, %c1_63] : memref<16x2xf32, #tpu.memory_space<smem>>
    %146 = vector.broadcast %144 : f32 to vector<4x256xf32>
    %147 = arith.subf %5, %146 : vector<4x256xf32>
    %148 = vector.broadcast %145 : f32 to vector<4x256xf32>
    %149 = arith.subf %11, %148 : vector<4x256xf32>
    %150 = arith.mulf %147, %147 : vector<4x256xf32>
    %151 = arith.mulf %149, %149 : vector<4x256xf32>
    %152 = arith.addf %150, %151 : vector<4x256xf32>
    %cst_64 = arith.constant -1.000000e+00 : f32
    %153 = vector.broadcast %cst_64 : f32 to vector<4x256xf32>
    %154 = arith.mulf %153, %152 : vector<4x256xf32>
    %c13 = arith.constant 13 : index
    %c0_65 = arith.constant 0 : index
    %155 = memref.load %arg1[%c13, %c0_65] : memref<16x2xf32, #tpu.memory_space<smem>>
    %c13_66 = arith.constant 13 : index
    %c1_67 = arith.constant 1 : index
    %156 = memref.load %arg1[%c13_66, %c1_67] : memref<16x2xf32, #tpu.memory_space<smem>>
    %157 = vector.broadcast %155 : f32 to vector<4x256xf32>
    %158 = arith.subf %5, %157 : vector<4x256xf32>
    %159 = vector.broadcast %156 : f32 to vector<4x256xf32>
    %160 = arith.subf %11, %159 : vector<4x256xf32>
    %161 = arith.mulf %158, %158 : vector<4x256xf32>
    %162 = arith.mulf %160, %160 : vector<4x256xf32>
    %163 = arith.addf %161, %162 : vector<4x256xf32>
    %cst_68 = arith.constant -1.000000e+00 : f32
    %164 = vector.broadcast %cst_68 : f32 to vector<4x256xf32>
    %165 = arith.mulf %164, %163 : vector<4x256xf32>
    %c14 = arith.constant 14 : index
    %c0_69 = arith.constant 0 : index
    %166 = memref.load %arg1[%c14, %c0_69] : memref<16x2xf32, #tpu.memory_space<smem>>
    %c14_70 = arith.constant 14 : index
    %c1_71 = arith.constant 1 : index
    %167 = memref.load %arg1[%c14_70, %c1_71] : memref<16x2xf32, #tpu.memory_space<smem>>
    %168 = vector.broadcast %166 : f32 to vector<4x256xf32>
    %169 = arith.subf %5, %168 : vector<4x256xf32>
    %170 = vector.broadcast %167 : f32 to vector<4x256xf32>
    %171 = arith.subf %11, %170 : vector<4x256xf32>
    %172 = arith.mulf %169, %169 : vector<4x256xf32>
    %173 = arith.mulf %171, %171 : vector<4x256xf32>
    %174 = arith.addf %172, %173 : vector<4x256xf32>
    %cst_72 = arith.constant -1.000000e+00 : f32
    %175 = vector.broadcast %cst_72 : f32 to vector<4x256xf32>
    %176 = arith.mulf %175, %174 : vector<4x256xf32>
    %c15 = arith.constant 15 : index
    %c0_73 = arith.constant 0 : index
    %177 = memref.load %arg1[%c15, %c0_73] : memref<16x2xf32, #tpu.memory_space<smem>>
    %c15_74 = arith.constant 15 : index
    %c1_75 = arith.constant 1 : index
    %178 = memref.load %arg1[%c15_74, %c1_75] : memref<16x2xf32, #tpu.memory_space<smem>>
    %179 = vector.broadcast %177 : f32 to vector<4x256xf32>
    %180 = arith.subf %5, %179 : vector<4x256xf32>
    %181 = vector.broadcast %178 : f32 to vector<4x256xf32>
    %182 = arith.subf %11, %181 : vector<4x256xf32>
    %183 = arith.mulf %180, %180 : vector<4x256xf32>
    %184 = arith.mulf %182, %182 : vector<4x256xf32>
    %185 = arith.addf %183, %184 : vector<4x256xf32>
    %cst_76 = arith.constant -1.000000e+00 : f32
    %186 = vector.broadcast %cst_76 : f32 to vector<4x256xf32>
    %187 = arith.mulf %186, %185 : vector<4x256xf32>
    %c0_i32 = arith.constant 0 : i32
    %188 = vector.broadcast %c0_i32 : i32 to vector<4x256xi32>
    %189 = arith.cmpf ogt, %33, %22 : vector<4x256xf32>
    %190 = arith.select %189, %33, %22 : vector<4x256xi1>, vector<4x256xf32>
    %c1_i32 = arith.constant 1 : i32
    %191 = vector.broadcast %c1_i32 : i32 to vector<4x256xi32>
    %192 = arith.select %189, %191, %188 : vector<4x256xi1>, vector<4x256xi32>
    %193 = arith.cmpf ogt, %44, %190 : vector<4x256xf32>
    %194 = arith.select %193, %44, %190 : vector<4x256xi1>, vector<4x256xf32>
    %c2_i32 = arith.constant 2 : i32
    %195 = vector.broadcast %c2_i32 : i32 to vector<4x256xi32>
    %196 = arith.select %193, %195, %192 : vector<4x256xi1>, vector<4x256xi32>
    %197 = arith.cmpf ogt, %55, %194 : vector<4x256xf32>
    %198 = arith.select %197, %55, %194 : vector<4x256xi1>, vector<4x256xf32>
    %c3_i32 = arith.constant 3 : i32
    %199 = vector.broadcast %c3_i32 : i32 to vector<4x256xi32>
    %200 = arith.select %197, %199, %196 : vector<4x256xi1>, vector<4x256xi32>
    %201 = arith.cmpf ogt, %66, %198 : vector<4x256xf32>
    %202 = arith.select %201, %66, %198 : vector<4x256xi1>, vector<4x256xf32>
    %c4_i32 = arith.constant 4 : i32
    %203 = vector.broadcast %c4_i32 : i32 to vector<4x256xi32>
    %204 = arith.select %201, %203, %200 : vector<4x256xi1>, vector<4x256xi32>
    %205 = arith.cmpf ogt, %77, %202 : vector<4x256xf32>
    %206 = arith.select %205, %77, %202 : vector<4x256xi1>, vector<4x256xf32>
    %c5_i32 = arith.constant 5 : i32
    %207 = vector.broadcast %c5_i32 : i32 to vector<4x256xi32>
    %208 = arith.select %205, %207, %204 : vector<4x256xi1>, vector<4x256xi32>
    %209 = arith.cmpf ogt, %88, %206 : vector<4x256xf32>
    %210 = arith.select %209, %88, %206 : vector<4x256xi1>, vector<4x256xf32>
    %c6_i32 = arith.constant 6 : i32
    %211 = vector.broadcast %c6_i32 : i32 to vector<4x256xi32>
    %212 = arith.select %209, %211, %208 : vector<4x256xi1>, vector<4x256xi32>
    %213 = arith.cmpf ogt, %99, %210 : vector<4x256xf32>
    %214 = arith.select %213, %99, %210 : vector<4x256xi1>, vector<4x256xf32>
    %c7_i32 = arith.constant 7 : i32
    %215 = vector.broadcast %c7_i32 : i32 to vector<4x256xi32>
    %216 = arith.select %213, %215, %212 : vector<4x256xi1>, vector<4x256xi32>
    %217 = arith.cmpf ogt, %110, %214 : vector<4x256xf32>
    %218 = arith.select %217, %110, %214 : vector<4x256xi1>, vector<4x256xf32>
    %c8_i32 = arith.constant 8 : i32
    %219 = vector.broadcast %c8_i32 : i32 to vector<4x256xi32>
    %220 = arith.select %217, %219, %216 : vector<4x256xi1>, vector<4x256xi32>
    %221 = arith.cmpf ogt, %121, %218 : vector<4x256xf32>
    %222 = arith.select %221, %121, %218 : vector<4x256xi1>, vector<4x256xf32>
    %c9_i32 = arith.constant 9 : i32
    %223 = vector.broadcast %c9_i32 : i32 to vector<4x256xi32>
    %224 = arith.select %221, %223, %220 : vector<4x256xi1>, vector<4x256xi32>
    %225 = arith.cmpf ogt, %132, %222 : vector<4x256xf32>
    %226 = arith.select %225, %132, %222 : vector<4x256xi1>, vector<4x256xf32>
    %c10_i32 = arith.constant 10 : i32
    %227 = vector.broadcast %c10_i32 : i32 to vector<4x256xi32>
    %228 = arith.select %225, %227, %224 : vector<4x256xi1>, vector<4x256xi32>
    %229 = arith.cmpf ogt, %143, %226 : vector<4x256xf32>
    %230 = arith.select %229, %143, %226 : vector<4x256xi1>, vector<4x256xf32>
    %c11_i32 = arith.constant 11 : i32
    %231 = vector.broadcast %c11_i32 : i32 to vector<4x256xi32>
    %232 = arith.select %229, %231, %228 : vector<4x256xi1>, vector<4x256xi32>
    %233 = arith.cmpf ogt, %154, %230 : vector<4x256xf32>
    %234 = arith.select %233, %154, %230 : vector<4x256xi1>, vector<4x256xf32>
    %c12_i32 = arith.constant 12 : i32
    %235 = vector.broadcast %c12_i32 : i32 to vector<4x256xi32>
    %236 = arith.select %233, %235, %232 : vector<4x256xi1>, vector<4x256xi32>
    %237 = arith.cmpf ogt, %165, %234 : vector<4x256xf32>
    %238 = arith.select %237, %165, %234 : vector<4x256xi1>, vector<4x256xf32>
    %c13_i32 = arith.constant 13 : i32
    %239 = vector.broadcast %c13_i32 : i32 to vector<4x256xi32>
    %240 = arith.select %237, %239, %236 : vector<4x256xi1>, vector<4x256xi32>
    %241 = arith.cmpf ogt, %176, %238 : vector<4x256xf32>
    %242 = arith.select %241, %176, %238 : vector<4x256xi1>, vector<4x256xf32>
    %c14_i32 = arith.constant 14 : i32
    %243 = vector.broadcast %c14_i32 : i32 to vector<4x256xi32>
    %244 = arith.select %241, %243, %240 : vector<4x256xi1>, vector<4x256xi32>
    %245 = arith.cmpf ogt, %187, %242 : vector<4x256xf32>
    %246 = arith.select %245, %187, %242 : vector<4x256xi1>, vector<4x256xf32>
    %c15_i32 = arith.constant 15 : i32
    %247 = vector.broadcast %c15_i32 : i32 to vector<4x256xi32>
    %248 = arith.select %245, %247, %244 : vector<4x256xi1>, vector<4x256xi32>
    %249 = arith.subf %22, %246 : vector<4x256xf32>
    %250 = math.exp %249 : vector<4x256xf32>
    %251 = arith.subf %33, %246 : vector<4x256xf32>
    %252 = math.exp %251 : vector<4x256xf32>
    %253 = arith.subf %44, %246 : vector<4x256xf32>
    %254 = math.exp %253 : vector<4x256xf32>
    %255 = arith.subf %55, %246 : vector<4x256xf32>
    %256 = math.exp %255 : vector<4x256xf32>
    %257 = arith.subf %66, %246 : vector<4x256xf32>
    %258 = math.exp %257 : vector<4x256xf32>
    %259 = arith.subf %77, %246 : vector<4x256xf32>
    %260 = math.exp %259 : vector<4x256xf32>
    %261 = arith.subf %88, %246 : vector<4x256xf32>
    %262 = math.exp %261 : vector<4x256xf32>
    %263 = arith.subf %99, %246 : vector<4x256xf32>
    %264 = math.exp %263 : vector<4x256xf32>
    %265 = arith.subf %110, %246 : vector<4x256xf32>
    %266 = math.exp %265 : vector<4x256xf32>
    %267 = arith.subf %121, %246 : vector<4x256xf32>
    %268 = math.exp %267 : vector<4x256xf32>
    %269 = arith.subf %132, %246 : vector<4x256xf32>
    %270 = math.exp %269 : vector<4x256xf32>
    %271 = arith.subf %143, %246 : vector<4x256xf32>
    %272 = math.exp %271 : vector<4x256xf32>
    %273 = arith.subf %154, %246 : vector<4x256xf32>
    %274 = math.exp %273 : vector<4x256xf32>
    %275 = arith.subf %165, %246 : vector<4x256xf32>
    %276 = math.exp %275 : vector<4x256xf32>
    %277 = arith.subf %176, %246 : vector<4x256xf32>
    %278 = math.exp %277 : vector<4x256xf32>
    %279 = arith.subf %187, %246 : vector<4x256xf32>
    %280 = math.exp %279 : vector<4x256xf32>
    %281 = arith.addf %250, %252 : vector<4x256xf32>
    %282 = arith.addf %281, %254 : vector<4x256xf32>
    %283 = arith.addf %282, %256 : vector<4x256xf32>
    %284 = arith.addf %283, %258 : vector<4x256xf32>
    %285 = arith.addf %284, %260 : vector<4x256xf32>
    %286 = arith.addf %285, %262 : vector<4x256xf32>
    %287 = arith.addf %286, %264 : vector<4x256xf32>
    %288 = arith.addf %287, %266 : vector<4x256xf32>
    %289 = arith.addf %288, %268 : vector<4x256xf32>
    %290 = arith.addf %289, %270 : vector<4x256xf32>
    %291 = arith.addf %290, %272 : vector<4x256xf32>
    %292 = arith.addf %291, %274 : vector<4x256xf32>
    %293 = arith.addf %292, %276 : vector<4x256xf32>
    %294 = arith.addf %293, %278 : vector<4x256xf32>
    %295 = arith.addf %294, %280 : vector<4x256xf32>
    %296 = tpu.reciprocal %295 {approx = true} : vector<4x256xf32> -> vector<4x256xf32>
    %cst_77 = arith.constant 9.765625E-4 : f32
    %297 = vector.broadcast %cst_77 : f32 to vector<4x256xf32>
    %298 = arith.mulf %296, %297 : vector<4x256xf32>
    %299 = tpu.iota {dimensions = array<i32: 1>} : vector<1x16xi32>
    %cst_78 = arith.constant 0.000000e+00 : f32
    %300 = vector.broadcast %cst_78 : f32 to vector<1x16xf32>
    %c0_i32_79 = arith.constant 0 : i32
    %301 = vector.broadcast %c0_i32_79 : i32 to vector<1x16xi32>
    %302 = arith.cmpi eq, %299, %301 : vector<1x16xi32>
    %303 = arith.mulf %250, %298 : vector<4x256xf32>
    %304 = vector.shape_cast %303 : vector<4x256xf32> to vector<1x4x256xf32>
    %cst_80 = arith.constant dense<0.000000e+00> : vector<1xf32>
    %305 = vector.multi_reduction <add>, %304, %cst_80 [1, 2] : vector<1x4x256xf32> to vector<1xf32>
    %306 = vector.shape_cast %305 : vector<1xf32> to vector<1x1x1xf32>
    %307 = vector.extract %306[0, 0, 0] : f32 from vector<1x1x1xf32>
    %cst_81 = arith.constant 0.000000e+00 : f32
    %308 = vector.broadcast %307 : f32 to vector<1x16xf32>
    %309 = vector.broadcast %cst_81 : f32 to vector<1x16xf32>
    %310 = arith.select %302, %308, %309 : vector<1x16xi1>, vector<1x16xf32>
    %311 = arith.addf %300, %310 : vector<1x16xf32>
    %c1_i32_82 = arith.constant 1 : i32
    %312 = vector.broadcast %c1_i32_82 : i32 to vector<1x16xi32>
    %313 = arith.cmpi eq, %299, %312 : vector<1x16xi32>
    %314 = arith.mulf %252, %298 : vector<4x256xf32>
    %315 = vector.shape_cast %314 : vector<4x256xf32> to vector<1x4x256xf32>
    %cst_83 = arith.constant dense<0.000000e+00> : vector<1xf32>
    %316 = vector.multi_reduction <add>, %315, %cst_83 [1, 2] : vector<1x4x256xf32> to vector<1xf32>
    %317 = vector.shape_cast %316 : vector<1xf32> to vector<1x1x1xf32>
    %318 = vector.extract %317[0, 0, 0] : f32 from vector<1x1x1xf32>
    %cst_84 = arith.constant 0.000000e+00 : f32
    %319 = vector.broadcast %318 : f32 to vector<1x16xf32>
    %320 = vector.broadcast %cst_84 : f32 to vector<1x16xf32>
    %321 = arith.select %313, %319, %320 : vector<1x16xi1>, vector<1x16xf32>
    %322 = arith.addf %311, %321 : vector<1x16xf32>
    %c2_i32_85 = arith.constant 2 : i32
    %323 = vector.broadcast %c2_i32_85 : i32 to vector<1x16xi32>
    %324 = arith.cmpi eq, %299, %323 : vector<1x16xi32>
    %325 = arith.mulf %254, %298 : vector<4x256xf32>
    %326 = vector.shape_cast %325 : vector<4x256xf32> to vector<1x4x256xf32>
    %cst_86 = arith.constant dense<0.000000e+00> : vector<1xf32>
    %327 = vector.multi_reduction <add>, %326, %cst_86 [1, 2] : vector<1x4x256xf32> to vector<1xf32>
    %328 = vector.shape_cast %327 : vector<1xf32> to vector<1x1x1xf32>
    %329 = vector.extract %328[0, 0, 0] : f32 from vector<1x1x1xf32>
    %cst_87 = arith.constant 0.000000e+00 : f32
    %330 = vector.broadcast %329 : f32 to vector<1x16xf32>
    %331 = vector.broadcast %cst_87 : f32 to vector<1x16xf32>
    %332 = arith.select %324, %330, %331 : vector<1x16xi1>, vector<1x16xf32>
    %333 = arith.addf %322, %332 : vector<1x16xf32>
    %c3_i32_88 = arith.constant 3 : i32
    %334 = vector.broadcast %c3_i32_88 : i32 to vector<1x16xi32>
    %335 = arith.cmpi eq, %299, %334 : vector<1x16xi32>
    %336 = arith.mulf %256, %298 : vector<4x256xf32>
    %337 = vector.shape_cast %336 : vector<4x256xf32> to vector<1x4x256xf32>
    %cst_89 = arith.constant dense<0.000000e+00> : vector<1xf32>
    %338 = vector.multi_reduction <add>, %337, %cst_89 [1, 2] : vector<1x4x256xf32> to vector<1xf32>
    %339 = vector.shape_cast %338 : vector<1xf32> to vector<1x1x1xf32>
    %340 = vector.extract %339[0, 0, 0] : f32 from vector<1x1x1xf32>
    %cst_90 = arith.constant 0.000000e+00 : f32
    %341 = vector.broadcast %340 : f32 to vector<1x16xf32>
    %342 = vector.broadcast %cst_90 : f32 to vector<1x16xf32>
    %343 = arith.select %335, %341, %342 : vector<1x16xi1>, vector<1x16xf32>
    %344 = arith.addf %333, %343 : vector<1x16xf32>
    %c4_i32_91 = arith.constant 4 : i32
    %345 = vector.broadcast %c4_i32_91 : i32 to vector<1x16xi32>
    %346 = arith.cmpi eq, %299, %345 : vector<1x16xi32>
    %347 = arith.mulf %258, %298 : vector<4x256xf32>
    %348 = vector.shape_cast %347 : vector<4x256xf32> to vector<1x4x256xf32>
    %cst_92 = arith.constant dense<0.000000e+00> : vector<1xf32>
    %349 = vector.multi_reduction <add>, %348, %cst_92 [1, 2] : vector<1x4x256xf32> to vector<1xf32>
    %350 = vector.shape_cast %349 : vector<1xf32> to vector<1x1x1xf32>
    %351 = vector.extract %350[0, 0, 0] : f32 from vector<1x1x1xf32>
    %cst_93 = arith.constant 0.000000e+00 : f32
    %352 = vector.broadcast %351 : f32 to vector<1x16xf32>
    %353 = vector.broadcast %cst_93 : f32 to vector<1x16xf32>
    %354 = arith.select %346, %352, %353 : vector<1x16xi1>, vector<1x16xf32>
    %355 = arith.addf %344, %354 : vector<1x16xf32>
    %c5_i32_94 = arith.constant 5 : i32
    %356 = vector.broadcast %c5_i32_94 : i32 to vector<1x16xi32>
    %357 = arith.cmpi eq, %299, %356 : vector<1x16xi32>
    %358 = arith.mulf %260, %298 : vector<4x256xf32>
    %359 = vector.shape_cast %358 : vector<4x256xf32> to vector<1x4x256xf32>
    %cst_95 = arith.constant dense<0.000000e+00> : vector<1xf32>
    %360 = vector.multi_reduction <add>, %359, %cst_95 [1, 2] : vector<1x4x256xf32> to vector<1xf32>
    %361 = vector.shape_cast %360 : vector<1xf32> to vector<1x1x1xf32>
    %362 = vector.extract %361[0, 0, 0] : f32 from vector<1x1x1xf32>
    %cst_96 = arith.constant 0.000000e+00 : f32
    %363 = vector.broadcast %362 : f32 to vector<1x16xf32>
    %364 = vector.broadcast %cst_96 : f32 to vector<1x16xf32>
    %365 = arith.select %357, %363, %364 : vector<1x16xi1>, vector<1x16xf32>
    %366 = arith.addf %355, %365 : vector<1x16xf32>
    %c6_i32_97 = arith.constant 6 : i32
    %367 = vector.broadcast %c6_i32_97 : i32 to vector<1x16xi32>
    %368 = arith.cmpi eq, %299, %367 : vector<1x16xi32>
    %369 = arith.mulf %262, %298 : vector<4x256xf32>
    %370 = vector.shape_cast %369 : vector<4x256xf32> to vector<1x4x256xf32>
    %cst_98 = arith.constant dense<0.000000e+00> : vector<1xf32>
    %371 = vector.multi_reduction <add>, %370, %cst_98 [1, 2] : vector<1x4x256xf32> to vector<1xf32>
    %372 = vector.shape_cast %371 : vector<1xf32> to vector<1x1x1xf32>
    %373 = vector.extract %372[0, 0, 0] : f32 from vector<1x1x1xf32>
    %cst_99 = arith.constant 0.000000e+00 : f32
    %374 = vector.broadcast %373 : f32 to vector<1x16xf32>
    %375 = vector.broadcast %cst_99 : f32 to vector<1x16xf32>
    %376 = arith.select %368, %374, %375 : vector<1x16xi1>, vector<1x16xf32>
    %377 = arith.addf %366, %376 : vector<1x16xf32>
    %c7_i32_100 = arith.constant 7 : i32
    %378 = vector.broadcast %c7_i32_100 : i32 to vector<1x16xi32>
    %379 = arith.cmpi eq, %299, %378 : vector<1x16xi32>
    %380 = arith.mulf %264, %298 : vector<4x256xf32>
    %381 = vector.shape_cast %380 : vector<4x256xf32> to vector<1x4x256xf32>
    %cst_101 = arith.constant dense<0.000000e+00> : vector<1xf32>
    %382 = vector.multi_reduction <add>, %381, %cst_101 [1, 2] : vector<1x4x256xf32> to vector<1xf32>
    %383 = vector.shape_cast %382 : vector<1xf32> to vector<1x1x1xf32>
    %384 = vector.extract %383[0, 0, 0] : f32 from vector<1x1x1xf32>
    %cst_102 = arith.constant 0.000000e+00 : f32
    %385 = vector.broadcast %384 : f32 to vector<1x16xf32>
    %386 = vector.broadcast %cst_102 : f32 to vector<1x16xf32>
    %387 = arith.select %379, %385, %386 : vector<1x16xi1>, vector<1x16xf32>
    %388 = arith.addf %377, %387 : vector<1x16xf32>
    %c8_i32_103 = arith.constant 8 : i32
    %389 = vector.broadcast %c8_i32_103 : i32 to vector<1x16xi32>
    %390 = arith.cmpi eq, %299, %389 : vector<1x16xi32>
    %391 = arith.mulf %266, %298 : vector<4x256xf32>
    %392 = vector.shape_cast %391 : vector<4x256xf32> to vector<1x4x256xf32>
    %cst_104 = arith.constant dense<0.000000e+00> : vector<1xf32>
    %393 = vector.multi_reduction <add>, %392, %cst_104 [1, 2] : vector<1x4x256xf32> to vector<1xf32>
    %394 = vector.shape_cast %393 : vector<1xf32> to vector<1x1x1xf32>
    %395 = vector.extract %394[0, 0, 0] : f32 from vector<1x1x1xf32>
    %cst_105 = arith.constant 0.000000e+00 : f32
    %396 = vector.broadcast %395 : f32 to vector<1x16xf32>
    %397 = vector.broadcast %cst_105 : f32 to vector<1x16xf32>
    %398 = arith.select %390, %396, %397 : vector<1x16xi1>, vector<1x16xf32>
    %399 = arith.addf %388, %398 : vector<1x16xf32>
    %c9_i32_106 = arith.constant 9 : i32
    %400 = vector.broadcast %c9_i32_106 : i32 to vector<1x16xi32>
    %401 = arith.cmpi eq, %299, %400 : vector<1x16xi32>
    %402 = arith.mulf %268, %298 : vector<4x256xf32>
    %403 = vector.shape_cast %402 : vector<4x256xf32> to vector<1x4x256xf32>
    %cst_107 = arith.constant dense<0.000000e+00> : vector<1xf32>
    %404 = vector.multi_reduction <add>, %403, %cst_107 [1, 2] : vector<1x4x256xf32> to vector<1xf32>
    %405 = vector.shape_cast %404 : vector<1xf32> to vector<1x1x1xf32>
    %406 = vector.extract %405[0, 0, 0] : f32 from vector<1x1x1xf32>
    %cst_108 = arith.constant 0.000000e+00 : f32
    %407 = vector.broadcast %406 : f32 to vector<1x16xf32>
    %408 = vector.broadcast %cst_108 : f32 to vector<1x16xf32>
    %409 = arith.select %401, %407, %408 : vector<1x16xi1>, vector<1x16xf32>
    %410 = arith.addf %399, %409 : vector<1x16xf32>
    %c10_i32_109 = arith.constant 10 : i32
    %411 = vector.broadcast %c10_i32_109 : i32 to vector<1x16xi32>
    %412 = arith.cmpi eq, %299, %411 : vector<1x16xi32>
    %413 = arith.mulf %270, %298 : vector<4x256xf32>
    %414 = vector.shape_cast %413 : vector<4x256xf32> to vector<1x4x256xf32>
    %cst_110 = arith.constant dense<0.000000e+00> : vector<1xf32>
    %415 = vector.multi_reduction <add>, %414, %cst_110 [1, 2] : vector<1x4x256xf32> to vector<1xf32>
    %416 = vector.shape_cast %415 : vector<1xf32> to vector<1x1x1xf32>
    %417 = vector.extract %416[0, 0, 0] : f32 from vector<1x1x1xf32>
    %cst_111 = arith.constant 0.000000e+00 : f32
    %418 = vector.broadcast %417 : f32 to vector<1x16xf32>
    %419 = vector.broadcast %cst_111 : f32 to vector<1x16xf32>
    %420 = arith.select %412, %418, %419 : vector<1x16xi1>, vector<1x16xf32>
    %421 = arith.addf %410, %420 : vector<1x16xf32>
    %c11_i32_112 = arith.constant 11 : i32
    %422 = vector.broadcast %c11_i32_112 : i32 to vector<1x16xi32>
    %423 = arith.cmpi eq, %299, %422 : vector<1x16xi32>
    %424 = arith.mulf %272, %298 : vector<4x256xf32>
    %425 = vector.shape_cast %424 : vector<4x256xf32> to vector<1x4x256xf32>
    %cst_113 = arith.constant dense<0.000000e+00> : vector<1xf32>
    %426 = vector.multi_reduction <add>, %425, %cst_113 [1, 2] : vector<1x4x256xf32> to vector<1xf32>
    %427 = vector.shape_cast %426 : vector<1xf32> to vector<1x1x1xf32>
    %428 = vector.extract %427[0, 0, 0] : f32 from vector<1x1x1xf32>
    %cst_114 = arith.constant 0.000000e+00 : f32
    %429 = vector.broadcast %428 : f32 to vector<1x16xf32>
    %430 = vector.broadcast %cst_114 : f32 to vector<1x16xf32>
    %431 = arith.select %423, %429, %430 : vector<1x16xi1>, vector<1x16xf32>
    %432 = arith.addf %421, %431 : vector<1x16xf32>
    %c12_i32_115 = arith.constant 12 : i32
    %433 = vector.broadcast %c12_i32_115 : i32 to vector<1x16xi32>
    %434 = arith.cmpi eq, %299, %433 : vector<1x16xi32>
    %435 = arith.mulf %274, %298 : vector<4x256xf32>
    %436 = vector.shape_cast %435 : vector<4x256xf32> to vector<1x4x256xf32>
    %cst_116 = arith.constant dense<0.000000e+00> : vector<1xf32>
    %437 = vector.multi_reduction <add>, %436, %cst_116 [1, 2] : vector<1x4x256xf32> to vector<1xf32>
    %438 = vector.shape_cast %437 : vector<1xf32> to vector<1x1x1xf32>
    %439 = vector.extract %438[0, 0, 0] : f32 from vector<1x1x1xf32>
    %cst_117 = arith.constant 0.000000e+00 : f32
    %440 = vector.broadcast %439 : f32 to vector<1x16xf32>
    %441 = vector.broadcast %cst_117 : f32 to vector<1x16xf32>
    %442 = arith.select %434, %440, %441 : vector<1x16xi1>, vector<1x16xf32>
    %443 = arith.addf %432, %442 : vector<1x16xf32>
    %c13_i32_118 = arith.constant 13 : i32
    %444 = vector.broadcast %c13_i32_118 : i32 to vector<1x16xi32>
    %445 = arith.cmpi eq, %299, %444 : vector<1x16xi32>
    %446 = arith.mulf %276, %298 : vector<4x256xf32>
    %447 = vector.shape_cast %446 : vector<4x256xf32> to vector<1x4x256xf32>
    %cst_119 = arith.constant dense<0.000000e+00> : vector<1xf32>
    %448 = vector.multi_reduction <add>, %447, %cst_119 [1, 2] : vector<1x4x256xf32> to vector<1xf32>
    %449 = vector.shape_cast %448 : vector<1xf32> to vector<1x1x1xf32>
    %450 = vector.extract %449[0, 0, 0] : f32 from vector<1x1x1xf32>
    %cst_120 = arith.constant 0.000000e+00 : f32
    %451 = vector.broadcast %450 : f32 to vector<1x16xf32>
    %452 = vector.broadcast %cst_120 : f32 to vector<1x16xf32>
    %453 = arith.select %445, %451, %452 : vector<1x16xi1>, vector<1x16xf32>
    %454 = arith.addf %443, %453 : vector<1x16xf32>
    %c14_i32_121 = arith.constant 14 : i32
    %455 = vector.broadcast %c14_i32_121 : i32 to vector<1x16xi32>
    %456 = arith.cmpi eq, %299, %455 : vector<1x16xi32>
    %457 = arith.mulf %278, %298 : vector<4x256xf32>
    %458 = vector.shape_cast %457 : vector<4x256xf32> to vector<1x4x256xf32>
    %cst_122 = arith.constant dense<0.000000e+00> : vector<1xf32>
    %459 = vector.multi_reduction <add>, %458, %cst_122 [1, 2] : vector<1x4x256xf32> to vector<1xf32>
    %460 = vector.shape_cast %459 : vector<1xf32> to vector<1x1x1xf32>
    %461 = vector.extract %460[0, 0, 0] : f32 from vector<1x1x1xf32>
    %cst_123 = arith.constant 0.000000e+00 : f32
    %462 = vector.broadcast %461 : f32 to vector<1x16xf32>
    %463 = vector.broadcast %cst_123 : f32 to vector<1x16xf32>
    %464 = arith.select %456, %462, %463 : vector<1x16xi1>, vector<1x16xf32>
    %465 = arith.addf %454, %464 : vector<1x16xf32>
    %c15_i32_124 = arith.constant 15 : i32
    %466 = vector.broadcast %c15_i32_124 : i32 to vector<1x16xi32>
    %467 = arith.cmpi eq, %299, %466 : vector<1x16xi32>
    %468 = arith.mulf %280, %298 : vector<4x256xf32>
    %469 = vector.shape_cast %468 : vector<4x256xf32> to vector<1x4x256xf32>
    %cst_125 = arith.constant dense<0.000000e+00> : vector<1xf32>
    %470 = vector.multi_reduction <add>, %469, %cst_125 [1, 2] : vector<1x4x256xf32> to vector<1xf32>
    %471 = vector.shape_cast %470 : vector<1xf32> to vector<1x1x1xf32>
    %472 = vector.extract %471[0, 0, 0] : f32 from vector<1x1x1xf32>
    %cst_126 = arith.constant 0.000000e+00 : f32
    %473 = vector.broadcast %472 : f32 to vector<1x16xf32>
    %474 = vector.broadcast %cst_126 : f32 to vector<1x16xf32>
    %475 = arith.select %467, %473, %474 : vector<1x16xi1>, vector<1x16xf32>
    %476 = arith.addf %465, %475 : vector<1x16xf32>
    %c0_127 = arith.constant 0 : index
    %c0_128 = arith.constant 0 : index
    %477 = vector.load %arg13[%c0_127, %c0_128] : memref<1x16xf32, #tpu.memory_space<vmem>>, vector<1x16xf32>
    tpu.vector_store %arg13[%c0_127, %c0_128], %476 {strides = array<i32>} : memref<1x16xf32, #tpu.memory_space<vmem>>, vector<1x16xf32>,
    %cst_129 = arith.constant 0.000000e+00 : f32
    %478 = vector.broadcast %cst_129 : f32 to vector<4x256xf32>
    %cst_130 = arith.constant 0.000000e+00 : f32
    %479 = vector.broadcast %cst_130 : f32 to vector<4x256xf32>
    %c0_i32_131 = arith.constant 0 : i32
    %480 = vector.broadcast %c0_i32_131 : i32 to vector<4x256xi32>
    %481 = arith.cmpi eq, %248, %480 : vector<4x256xi32>
    %c0_132 = arith.constant 0 : index
    %c0_133 = arith.constant 0 : index
    %482 = memref.load %arg1[%c0_132, %c0_133] : memref<16x2xf32, #tpu.memory_space<smem>>
    %483 = vector.broadcast %482 : f32 to vector<4x256xf32>
    %484 = arith.select %481, %483, %478 : vector<4x256xi1>, vector<4x256xf32>
    %c0_134 = arith.constant 0 : index
    %c1_135 = arith.constant 1 : index
    %485 = memref.load %arg1[%c0_134, %c1_135] : memref<16x2xf32, #tpu.memory_space<smem>>
    %486 = vector.broadcast %485 : f32 to vector<4x256xf32>
    %487 = arith.select %481, %486, %479 : vector<4x256xi1>, vector<4x256xf32>
    %c1_i32_136 = arith.constant 1 : i32
    %488 = vector.broadcast %c1_i32_136 : i32 to vector<4x256xi32>
    %489 = arith.cmpi eq, %248, %488 : vector<4x256xi32>
    %c1_137 = arith.constant 1 : index
    %c0_138 = arith.constant 0 : index
    %490 = memref.load %arg1[%c1_137, %c0_138] : memref<16x2xf32, #tpu.memory_space<smem>>
    %491 = vector.broadcast %490 : f32 to vector<4x256xf32>
    %492 = arith.select %489, %491, %484 : vector<4x256xi1>, vector<4x256xf32>
    %c1_139 = arith.constant 1 : index
    %c1_140 = arith.constant 1 : index
    %493 = memref.load %arg1[%c1_139, %c1_140] : memref<16x2xf32, #tpu.memory_space<smem>>
    %494 = vector.broadcast %493 : f32 to vector<4x256xf32>
    %495 = arith.select %489, %494, %487 : vector<4x256xi1>, vector<4x256xf32>
    %c2_i32_141 = arith.constant 2 : i32
    %496 = vector.broadcast %c2_i32_141 : i32 to vector<4x256xi32>
    %497 = arith.cmpi eq, %248, %496 : vector<4x256xi32>
    %c2_142 = arith.constant 2 : index
    %c0_143 = arith.constant 0 : index
    %498 = memref.load %arg1[%c2_142, %c0_143] : memref<16x2xf32, #tpu.memory_space<smem>>
    %499 = vector.broadcast %498 : f32 to vector<4x256xf32>
    %500 = arith.select %497, %499, %492 : vector<4x256xi1>, vector<4x256xf32>
    %c2_144 = arith.constant 2 : index
    %c1_145 = arith.constant 1 : index
    %501 = memref.load %arg1[%c2_144, %c1_145] : memref<16x2xf32, #tpu.memory_space<smem>>
    %502 = vector.broadcast %501 : f32 to vector<4x256xf32>
    %503 = arith.select %497, %502, %495 : vector<4x256xi1>, vector<4x256xf32>
    %c3_i32_146 = arith.constant 3 : i32
    %504 = vector.broadcast %c3_i32_146 : i32 to vector<4x256xi32>
    %505 = arith.cmpi eq, %248, %504 : vector<4x256xi32>
    %c3_147 = arith.constant 3 : index
    %c0_148 = arith.constant 0 : index
    %506 = memref.load %arg1[%c3_147, %c0_148] : memref<16x2xf32, #tpu.memory_space<smem>>
    %507 = vector.broadcast %506 : f32 to vector<4x256xf32>
    %508 = arith.select %505, %507, %500 : vector<4x256xi1>, vector<4x256xf32>
    %c3_149 = arith.constant 3 : index
    %c1_150 = arith.constant 1 : index
    %509 = memref.load %arg1[%c3_149, %c1_150] : memref<16x2xf32, #tpu.memory_space<smem>>
    %510 = vector.broadcast %509 : f32 to vector<4x256xf32>
    %511 = arith.select %505, %510, %503 : vector<4x256xi1>, vector<4x256xf32>
    %c4_i32_151 = arith.constant 4 : i32
    %512 = vector.broadcast %c4_i32_151 : i32 to vector<4x256xi32>
    %513 = arith.cmpi eq, %248, %512 : vector<4x256xi32>
    %c4_152 = arith.constant 4 : index
    %c0_153 = arith.constant 0 : index
    %514 = memref.load %arg1[%c4_152, %c0_153] : memref<16x2xf32, #tpu.memory_space<smem>>
    %515 = vector.broadcast %514 : f32 to vector<4x256xf32>
    %516 = arith.select %513, %515, %508 : vector<4x256xi1>, vector<4x256xf32>
    %c4_154 = arith.constant 4 : index
    %c1_155 = arith.constant 1 : index
    %517 = memref.load %arg1[%c4_154, %c1_155] : memref<16x2xf32, #tpu.memory_space<smem>>
    %518 = vector.broadcast %517 : f32 to vector<4x256xf32>
    %519 = arith.select %513, %518, %511 : vector<4x256xi1>, vector<4x256xf32>
    %c5_i32_156 = arith.constant 5 : i32
    %520 = vector.broadcast %c5_i32_156 : i32 to vector<4x256xi32>
    %521 = arith.cmpi eq, %248, %520 : vector<4x256xi32>
    %c5_157 = arith.constant 5 : index
    %c0_158 = arith.constant 0 : index
    %522 = memref.load %arg1[%c5_157, %c0_158] : memref<16x2xf32, #tpu.memory_space<smem>>
    %523 = vector.broadcast %522 : f32 to vector<4x256xf32>
    %524 = arith.select %521, %523, %516 : vector<4x256xi1>, vector<4x256xf32>
    %c5_159 = arith.constant 5 : index
    %c1_160 = arith.constant 1 : index
    %525 = memref.load %arg1[%c5_159, %c1_160] : memref<16x2xf32, #tpu.memory_space<smem>>
    %526 = vector.broadcast %525 : f32 to vector<4x256xf32>
    %527 = arith.select %521, %526, %519 : vector<4x256xi1>, vector<4x256xf32>
    %c6_i32_161 = arith.constant 6 : i32
    %528 = vector.broadcast %c6_i32_161 : i32 to vector<4x256xi32>
    %529 = arith.cmpi eq, %248, %528 : vector<4x256xi32>
    %c6_162 = arith.constant 6 : index
    %c0_163 = arith.constant 0 : index
    %530 = memref.load %arg1[%c6_162, %c0_163] : memref<16x2xf32, #tpu.memory_space<smem>>
    %531 = vector.broadcast %530 : f32 to vector<4x256xf32>
    %532 = arith.select %529, %531, %524 : vector<4x256xi1>, vector<4x256xf32>
    %c6_164 = arith.constant 6 : index
    %c1_165 = arith.constant 1 : index
    %533 = memref.load %arg1[%c6_164, %c1_165] : memref<16x2xf32, #tpu.memory_space<smem>>
    %534 = vector.broadcast %533 : f32 to vector<4x256xf32>
    %535 = arith.select %529, %534, %527 : vector<4x256xi1>, vector<4x256xf32>
    %c7_i32_166 = arith.constant 7 : i32
    %536 = vector.broadcast %c7_i32_166 : i32 to vector<4x256xi32>
    %537 = arith.cmpi eq, %248, %536 : vector<4x256xi32>
    %c7_167 = arith.constant 7 : index
    %c0_168 = arith.constant 0 : index
    %538 = memref.load %arg1[%c7_167, %c0_168] : memref<16x2xf32, #tpu.memory_space<smem>>
    %539 = vector.broadcast %538 : f32 to vector<4x256xf32>
    %540 = arith.select %537, %539, %532 : vector<4x256xi1>, vector<4x256xf32>
    %c7_169 = arith.constant 7 : index
    %c1_170 = arith.constant 1 : index
    %541 = memref.load %arg1[%c7_169, %c1_170] : memref<16x2xf32, #tpu.memory_space<smem>>
    %542 = vector.broadcast %541 : f32 to vector<4x256xf32>
    %543 = arith.select %537, %542, %535 : vector<4x256xi1>, vector<4x256xf32>
    %c8_i32_171 = arith.constant 8 : i32
    %544 = vector.broadcast %c8_i32_171 : i32 to vector<4x256xi32>
    %545 = arith.cmpi eq, %248, %544 : vector<4x256xi32>
    %c8_172 = arith.constant 8 : index
    %c0_173 = arith.constant 0 : index
    %546 = memref.load %arg1[%c8_172, %c0_173] : memref<16x2xf32, #tpu.memory_space<smem>>
    %547 = vector.broadcast %546 : f32 to vector<4x256xf32>
    %548 = arith.select %545, %547, %540 : vector<4x256xi1>, vector<4x256xf32>
    %c8_174 = arith.constant 8 : index
    %c1_175 = arith.constant 1 : index
    %549 = memref.load %arg1[%c8_174, %c1_175] : memref<16x2xf32, #tpu.memory_space<smem>>
    %550 = vector.broadcast %549 : f32 to vector<4x256xf32>
    %551 = arith.select %545, %550, %543 : vector<4x256xi1>, vector<4x256xf32>
    %c9_i32_176 = arith.constant 9 : i32
    %552 = vector.broadcast %c9_i32_176 : i32 to vector<4x256xi32>
    %553 = arith.cmpi eq, %248, %552 : vector<4x256xi32>
    %c9_177 = arith.constant 9 : index
    %c0_178 = arith.constant 0 : index
    %554 = memref.load %arg1[%c9_177, %c0_178] : memref<16x2xf32, #tpu.memory_space<smem>>
    %555 = vector.broadcast %554 : f32 to vector<4x256xf32>
    %556 = arith.select %553, %555, %548 : vector<4x256xi1>, vector<4x256xf32>
    %c9_179 = arith.constant 9 : index
    %c1_180 = arith.constant 1 : index
    %557 = memref.load %arg1[%c9_179, %c1_180] : memref<16x2xf32, #tpu.memory_space<smem>>
    %558 = vector.broadcast %557 : f32 to vector<4x256xf32>
    %559 = arith.select %553, %558, %551 : vector<4x256xi1>, vector<4x256xf32>
    %c10_i32_181 = arith.constant 10 : i32
    %560 = vector.broadcast %c10_i32_181 : i32 to vector<4x256xi32>
    %561 = arith.cmpi eq, %248, %560 : vector<4x256xi32>
    %c10_182 = arith.constant 10 : index
    %c0_183 = arith.constant 0 : index
    %562 = memref.load %arg1[%c10_182, %c0_183] : memref<16x2xf32, #tpu.memory_space<smem>>
    %563 = vector.broadcast %562 : f32 to vector<4x256xf32>
    %564 = arith.select %561, %563, %556 : vector<4x256xi1>, vector<4x256xf32>
    %c10_184 = arith.constant 10 : index
    %c1_185 = arith.constant 1 : index
    %565 = memref.load %arg1[%c10_184, %c1_185] : memref<16x2xf32, #tpu.memory_space<smem>>
    %566 = vector.broadcast %565 : f32 to vector<4x256xf32>
    %567 = arith.select %561, %566, %559 : vector<4x256xi1>, vector<4x256xf32>
    %c11_i32_186 = arith.constant 11 : i32
    %568 = vector.broadcast %c11_i32_186 : i32 to vector<4x256xi32>
    %569 = arith.cmpi eq, %248, %568 : vector<4x256xi32>
    %c11_187 = arith.constant 11 : index
    %c0_188 = arith.constant 0 : index
    %570 = memref.load %arg1[%c11_187, %c0_188] : memref<16x2xf32, #tpu.memory_space<smem>>
    %571 = vector.broadcast %570 : f32 to vector<4x256xf32>
    %572 = arith.select %569, %571, %564 : vector<4x256xi1>, vector<4x256xf32>
    %c11_189 = arith.constant 11 : index
    %c1_190 = arith.constant 1 : index
    %573 = memref.load %arg1[%c11_189, %c1_190] : memref<16x2xf32, #tpu.memory_space<smem>>
    %574 = vector.broadcast %573 : f32 to vector<4x256xf32>
    %575 = arith.select %569, %574, %567 : vector<4x256xi1>, vector<4x256xf32>
    %c12_i32_191 = arith.constant 12 : i32
    %576 = vector.broadcast %c12_i32_191 : i32 to vector<4x256xi32>
    %577 = arith.cmpi eq, %248, %576 : vector<4x256xi32>
    %c12_192 = arith.constant 12 : index
    %c0_193 = arith.constant 0 : index
    %578 = memref.load %arg1[%c12_192, %c0_193] : memref<16x2xf32, #tpu.memory_space<smem>>
    %579 = vector.broadcast %578 : f32 to vector<4x256xf32>
    %580 = arith.select %577, %579, %572 : vector<4x256xi1>, vector<4x256xf32>
    %c12_194 = arith.constant 12 : index
    %c1_195 = arith.constant 1 : index
    %581 = memref.load %arg1[%c12_194, %c1_195] : memref<16x2xf32, #tpu.memory_space<smem>>
    %582 = vector.broadcast %581 : f32 to vector<4x256xf32>
    %583 = arith.select %577, %582, %575 : vector<4x256xi1>, vector<4x256xf32>
    %c13_i32_196 = arith.constant 13 : i32
    %584 = vector.broadcast %c13_i32_196 : i32 to vector<4x256xi32>
    %585 = arith.cmpi eq, %248, %584 : vector<4x256xi32>
    %c13_197 = arith.constant 13 : index
    %c0_198 = arith.constant 0 : index
    %586 = memref.load %arg1[%c13_197, %c0_198] : memref<16x2xf32, #tpu.memory_space<smem>>
    %587 = vector.broadcast %586 : f32 to vector<4x256xf32>
    %588 = arith.select %585, %587, %580 : vector<4x256xi1>, vector<4x256xf32>
    %c13_199 = arith.constant 13 : index
    %c1_200 = arith.constant 1 : index
    %589 = memref.load %arg1[%c13_199, %c1_200] : memref<16x2xf32, #tpu.memory_space<smem>>
    %590 = vector.broadcast %589 : f32 to vector<4x256xf32>
    %591 = arith.select %585, %590, %583 : vector<4x256xi1>, vector<4x256xf32>
    %c14_i32_201 = arith.constant 14 : i32
    %592 = vector.broadcast %c14_i32_201 : i32 to vector<4x256xi32>
    %593 = arith.cmpi eq, %248, %592 : vector<4x256xi32>
    %c14_202 = arith.constant 14 : index
    %c0_203 = arith.constant 0 : index
    %594 = memref.load %arg1[%c14_202, %c0_203] : memref<16x2xf32, #tpu.memory_space<smem>>
    %595 = vector.broadcast %594 : f32 to vector<4x256xf32>
    %596 = arith.select %593, %595, %588 : vector<4x256xi1>, vector<4x256xf32>
    %c14_204 = arith.constant 14 : index
    %c1_205 = arith.constant 1 : index
    %597 = memref.load %arg1[%c14_204, %c1_205] : memref<16x2xf32, #tpu.memory_space<smem>>
    %598 = vector.broadcast %597 : f32 to vector<4x256xf32>
    %599 = arith.select %593, %598, %591 : vector<4x256xi1>, vector<4x256xf32>
    %c15_i32_206 = arith.constant 15 : i32
    %600 = vector.broadcast %c15_i32_206 : i32 to vector<4x256xi32>
    %601 = arith.cmpi eq, %248, %600 : vector<4x256xi32>
    %c15_207 = arith.constant 15 : index
    %c0_208 = arith.constant 0 : index
    %602 = memref.load %arg1[%c15_207, %c0_208] : memref<16x2xf32, #tpu.memory_space<smem>>
    %603 = vector.broadcast %602 : f32 to vector<4x256xf32>
    %604 = arith.select %601, %603, %596 : vector<4x256xi1>, vector<4x256xf32>
    %c15_209 = arith.constant 15 : index
    %c1_210 = arith.constant 1 : index
    %605 = memref.load %arg1[%c15_209, %c1_210] : memref<16x2xf32, #tpu.memory_space<smem>>
    %606 = vector.broadcast %605 : f32 to vector<4x256xf32>
    %607 = arith.select %601, %606, %599 : vector<4x256xi1>, vector<4x256xf32>
    %608 = arith.mulf %604, %604 : vector<4x256xf32>
    %609 = arith.mulf %607, %607 : vector<4x256xf32>
    %610 = arith.addf %608, %609 : vector<4x256xf32>
    %611 = vector.shape_cast %610 : vector<4x256xf32> to vector<1x4x256xf32>
    %cst_211 = arith.constant dense<0.000000e+00> : vector<1xf32>
    %612 = vector.multi_reduction <add>, %611, %cst_211 [1, 2] : vector<1x4x256xf32> to vector<1xf32>
    %613 = vector.shape_cast %612 : vector<1xf32> to vector<1x1x1xf32>
    %614 = vector.extract %613[0, 0, 0] : f32 from vector<1x1x1xf32>
    %cst_212 = arith.constant 9.765625E-4 : f32
    %615 = arith.mulf %614, %cst_212 : f32
    %c0_213 = arith.constant 0 : index
    %c0_214 = arith.constant 0 : index
    %616 = memref.load %arg2[%c0_213, %c0_214] : memref<1x1xf32, #tpu.memory_space<smem>>
    %617 = arith.mulf %615, %616 : f32
    %618 = math.sqrt %617 : f32
    %c0_215 = arith.constant 0 : index
    %c0_216 = arith.constant 0 : index
    %619 = vector.load %arg9[%c0_215, %c0_216] : memref<4x256xf32, #tpu.memory_space<vmem>>, vector<4x256xf32>
    %620 = vector.broadcast %618 : f32 to vector<4x256xf32>
    %621 = arith.mulf %620, %619 : vector<4x256xf32>
    %622 = arith.addf %604, %621 : vector<4x256xf32>
    %c0_217 = arith.constant 0 : index
    %c0_218 = arith.constant 0 : index
    %623 = vector.load %arg10[%c0_217, %c0_218] : memref<4x256xf32, #tpu.memory_space<vmem>>, vector<4x256xf32>
    %624 = vector.broadcast %618 : f32 to vector<4x256xf32>
    %625 = arith.mulf %624, %623 : vector<4x256xf32>
    %626 = arith.addf %607, %625 : vector<4x256xf32>
    %c0_219 = arith.constant 0 : index
    %c0_220 = arith.constant 0 : index
    %627 = vector.load %arg7[%c0_219, %c0_220] : memref<3x4xf32, #tpu.memory_space<vmem>>, vector<3x4xf32>
    %cst_221 = arith.constant dense<0.000000e+00> : vector<3x256xf32>
    %628 = tpu.matmul %627, %622, %cst_221 {dimension_numbers = #tpu.dot_dimension_numbers<[1], [0], [0], [1], [0, 0, 1, 1], [], []>} : vector<3x4xf32>, vector<4x256xf32>, vector<3x256xf32> -> vector<3x256xf32>
    %c0_222 = arith.constant 0 : index
    %c0_223 = arith.constant 0 : index
    %629 = vector.load %arg8[%c0_222, %c0_223] : memref<3x1xf32, #tpu.memory_space<vmem>>, vector<3x1xf32>
    %630 = vector.broadcast %629 : vector<3x1xf32> to vector<3x256xf32>
    %631 = arith.addf %628, %630 : vector<3x256xf32>
    %c0_224 = arith.constant 0 : index
    %c0_225 = arith.constant 0 : index
    %632 = vector.load %arg7[%c0_224, %c0_225] : memref<3x4xf32, #tpu.memory_space<vmem>>, vector<3x4xf32>
    %cst_226 = arith.constant dense<0.000000e+00> : vector<3x256xf32>
    %633 = tpu.matmul %632, %626, %cst_226 {dimension_numbers = #tpu.dot_dimension_numbers<[1], [0], [0], [1], [0, 0, 1, 1], [], []>} : vector<3x4xf32>, vector<4x256xf32>, vector<3x256xf32> -> vector<3x256xf32>
    %c0_227 = arith.constant 0 : index
    %c0_228 = arith.constant 0 : index
    %634 = vector.load %arg8[%c0_227, %c0_228] : memref<3x1xf32, #tpu.memory_space<vmem>>, vector<3x1xf32>
    %635 = vector.broadcast %634 : vector<3x1xf32> to vector<3x256xf32>
    %636 = arith.addf %633, %635 : vector<3x256xf32>
    %637 = arith.negf %631 : vector<3x256xf32>
    %638 = math.exp %637 : vector<3x256xf32>
    %cst_229 = arith.constant 1.000000e+00 : f32
    %639 = vector.broadcast %cst_229 : f32 to vector<3x256xf32>
    %640 = arith.addf %639, %638 : vector<3x256xf32>
    %641 = arith.divf %639, %640 : vector<3x256xf32>
    %c0_230 = arith.constant 0 : index
    %c0_231 = arith.constant 0 : index
    %642 = vector.load %arg11[%c0_230, %c0_231] : memref<3x256xf32, #tpu.memory_space<vmem>>, vector<3x256xf32>
    tpu.vector_store %arg11[%c0_230, %c0_231], %641 {strides = array<i32>} : memref<3x256xf32, #tpu.memory_space<vmem>>, vector<3x256xf32>,
    %643 = arith.negf %636 : vector<3x256xf32>
    %644 = math.exp %643 : vector<3x256xf32>
    %cst_232 = arith.constant 1.000000e+00 : f32
    %645 = vector.broadcast %cst_232 : f32 to vector<3x256xf32>
    %646 = arith.addf %645, %644 : vector<3x256xf32>
    %647 = arith.divf %645, %646 : vector<3x256xf32>
    %c0_233 = arith.constant 0 : index
    %c0_234 = arith.constant 0 : index
    %648 = vector.load %arg12[%c0_233, %c0_234] : memref<3x256xf32, #tpu.memory_space<vmem>>, vector<3x256xf32>
    tpu.vector_store %arg12[%c0_233, %c0_234], %647 {strides = array<i32>} : memref<3x256xf32, #tpu.memory_space<vmem>>, vector<3x256xf32>,
    return
  }
  func.func @transform_0(%arg0: i32) -> (i32, i32) {
    %c0_i32 = arith.constant 0 : i32
    %c0_i32_0 = arith.constant 0 : i32
    %c0_i32_1 = arith.constant 0 : i32
    return %c0_i32, %c0_i32_0 : i32, i32
  }
  func.func @transform_1(%arg0: i32) -> (i32, i32) {
    %c0_i32 = arith.constant 0 : i32
    %c0_i32_0 = arith.constant 0 : i32
    %c0_i32_1 = arith.constant 0 : i32
    return %c0_i32, %c0_i32_0 : i32, i32
  }
  func.func @transform_2(%arg0: i32) -> (i32, i32) {
    %c0_i32 = arith.constant 0 : i32
    %c0_i32_0 = arith.constant 0 : i32
    %c0_i32_1 = arith.constant 0 : i32
    return %c0_i32, %c0_i32_0 : i32, i32
  }
  func.func @transform_3(%arg0: i32) -> (i32, i32) {
    %c0_i32 = arith.constant 0 : i32
    %c0_i32_0 = arith.constant 0 : i32
    %c0_i32_1 = arith.constant 0 : i32
    return %c0_i32, %c0_i32_0 : i32, i32
  }
  func.func @transform_4(%arg0: i32) -> (i32, i32) {
    %c0_i32 = arith.constant 0 : i32
    %c0_i32_0 = arith.constant 0 : i32
    %c0_i32_1 = arith.constant 0 : i32
    return %c0_i32, %c0_i32_0 : i32, i32
  }
  func.func @transform_5(%arg0: i32) -> (i32, i32) {
    %c0_i32 = arith.constant 0 : i32
    %c0_i32_0 = arith.constant 0 : i32
    %c0_i32_1 = arith.constant 0 : i32
    return %c0_i32, %c0_i32_0 : i32, i32
  }
  func.func @transform_6(%arg0: i32) -> (i32, i32) {
    %c0_i32 = arith.constant 0 : i32
    %c0_i32_0 = arith.constant 0 : i32
    %c0_i32_1 = arith.constant 0 : i32
    return %c0_i32, %c0_i32_0 : i32, i32
  }
  func.func @transform_7(%arg0: i32) -> (i32, i32) {
    %c0_i32 = arith.constant 0 : i32
    %c0_i32_0 = arith.constant 0 : i32
    %c0_i32_1 = arith.constant 0 : i32
    return %c0_i32, %c0_i32_0 : i32, i32
  }
  func.func @transform_8(%arg0: i32) -> (i32, i32) {
    %c0_i32 = arith.constant 0 : i32
    %c0_i32_0 = arith.constant 0 : i32
    %c0_i32_1 = arith.constant 0 : i32
    return %c0_i32, %c0_i32_0 : i32, i32
  }
  func.func @transform_9(%arg0: i32) -> (i32, i32) {
    %c0_i32 = arith.constant 0 : i32
    %c0_i32_0 = arith.constant 0 : i32
    %c0_i32_1 = arith.constant 0 : i32
    return %c0_i32, %c0_i32_0 : i32, i32
  }
  func.func @transform_10(%arg0: i32) -> (i32, i32) {
    %c0_i32 = arith.constant 0 : i32
    %c0_i32_0 = arith.constant 0 : i32
    %c0_i32_1 = arith.constant 0 : i32
    return %c0_i32, %c0_i32_0 : i32, i32
  }
  func.func @transform_11(%arg0: i32) -> (i32, i32) {
    %c0_i32 = arith.constant 0 : i32
    %c0_i32_0 = arith.constant 0 : i32
    %c0_i32_1 = arith.constant 0 : i32
    return %c0_i32, %c0_i32_0 : i32, i32
  }
  func.func @transform_12(%arg0: i32) -> (i32, i32) {
    %c0_i32 = arith.constant 0 : i32
    %c0_i32_0 = arith.constant 0 : i32
    %c0_i32_1 = arith.constant 0 : i32
    return %c0_i32, %c0_i32_0 : i32, i32
  }
}

</mosaic_0001>

<bundles_post_ra>
// kernel: tpu_custom_call.1
= control target key start
LH: loop header
LB: loop body
LE: loop exit
PB: predicated region body
PF: predicated region fallthrough
CT: control target
= control target key end

     0   :  { %s2835_s0 = inlined_call_operand.vmem [shape: f32[16,2], index: 0, kind: input, shape index: {}]   ;;  %s2836_s1 = inlined_call_operand.<no memory space> [shape: f32[1,1], index: 1, kind: input, shape index: {}]   ;;  %s2837_s2 = inlined_call_operand.vmem [shape: f32[3,256], index: 2, kind: input, shape index: {}]   ;;  %s2838_s3 = inlined_call_operand.vmem [shape: f32[3,256], index: 3, kind: input, shape index: {}]   ;;  %s2839_s4 = inlined_call_operand.vmem [shape: f32[4,3], index: 4, kind: input, shape index: {}]   ;;  %s2840_s5 = inlined_call_operand.vmem [shape: f32[4,1], index: 5, kind: input, shape index: {}]   ;;  %s2841_s6 = inlined_call_operand.vmem [shape: f32[3,4], index: 6, kind: input, shape index: {}]   ;;  %s2842_s7 = inlined_call_operand.vmem [shape: f32[3,1], index: 7, kind: input, shape index: {}]   ;;  %s2843_s8 = inlined_call_operand.hbm [shape: f32[4,256], index: 8, kind: input, shape index: {}]   ;;  %s2844_s9 = inlined_call_operand.vmem [shape: f32[4,256], index: 9, kind: input, shape index: {}]   ;;  %s2845_s10 = inlined_call_operand.hbm [shape: f32[3,256], index: 10, kind: output, shape index: {0}]   ;;  %s2846_s11 = inlined_call_operand.hbm [shape: f32[3,256], index: 11, kind: output, shape index: {1}]   ;;  %s2847_s12 = inlined_call_operand.hbm [shape: f32[1,16], index: 12, kind: output, shape index: {2}]  }
   0x1   :  { %2850 = sst [smem:[#allocation16_spill]] %s2846_s11 }
   0x2   :  { %2851 = sst [smem:[#allocation17_spill]] %s2847_s12 }
   0x3   :  { %19 = vsyncpa [#allocation6], 0 }
   0x4   :  { %20 = vsyncpa [#allocation4], 0 }
   0x5   :  { %21 = vsyncpa [#allocation5], 0 }
   0x6   :  { %22 = vsyncpa [#allocation10], 0  ;;  %s27_s23 = sshll.u32 %s2835_s0, 4  ;;  %s53_s26 = sshll.u32 %s2843_s8, 4  ;;  %s28_s23 = int_to_ptr.vmem [resolvable:$true] %s27_s23  ;;  %s54_s26 = int_to_ptr.hbm [resolvable:$true] %s53_s26 }
   0x7   :  { %s1735_s27 = smov [#allocation3]   ;;  %s1736_s28 = smov 128  }
   0x8   :  { %s1737_s29 = smov 8   ;;  %s1738_s30 = smov [#allocation7]  }
   0x9   :  { %33 = dma.vmem_to_smem %s28_s23, 256, %s1735_s27, [#allocation6], %s1736_s28, %s1736_s28, %s1737_s29  }
   0xa   :  { %s55_s13 = sshll.u32 %s1738_s30, 4  ;;  %s56_s13 = int_to_ptr.vmem [resolvable:$true] %s55_s13 }
   0xb   :  { %58 = dma.hbm_to_vmem [thread:$0]  %s54_s26, 128, %s56_s13, [#allocation4]  }
   0xc   :  { %1727 = dma.done.wait [#allocation6], 256  }
   0xd   :  { %1728 = vsyncadd [#allocation6], 4294967040 }
   0xe   :  { %1729 = dma.done.wait [#allocation4], 128  }
   0xf   :  { %1730 = vsyncadd [#allocation4], 4294967168 }
  0x10   :  { %69 = sfence }
  0x11   :  { %v71_v0 = vld [vmem:[%s2837_s2] sm:$0x77]  ;;  %v2848_v1 = vmov 0   ;;  %vm86_vm0 = vcmask 1042432   ;;  %vm82_vm1 = vcmask 23552   ;;  %s1832_s19 = sld [smem:[#allocation3 + $0x80]] }
  0x12   :  { %79 = vst [vmem:[#allocation1] ss:$2 sm:$0xff] %v71_v0  ;;  %1531 = vset.pattern.permute.xlu0 %v2848_v1  ;;  %v72_v2 = vld [vmem:[%s2840_s5] sm:$0xf]  ;;  %1532 = vset.pattern.permute.xlu2 %v2848_v1  ;;  %s1830_s5 = sld [smem:[#allocation3 + $0x1]] }
  0x13   :  { %75 = vperm.xlu0 %1531, %v72_v2   ;;  %v131_v3 = vld [vmem:[%s2838_s3] sm:$0x77]  ;;  %s1828_s3 = sld [smem:[#allocation3]] }
  0x14   :  { %v70_v6 = vld [vmem:[%s2839_s4] sm:$0xf]  ;;  %s1834_s20 = sld [smem:[#allocation3 + $0x81]] }
  0x15   :  { %s1836_s4 = sld [smem:[#allocation3 + $0x100]] }
  0x16   :  { %s1838_s21 = sld [smem:[#allocation3 + $0x101]] }
  0x17   :  { %s1840_s22 = sld [smem:[#allocation3 + $0x180]]  ;;  %v198_v14 = vstv %s1832_s19 }
  0x18   :  { %s1842_s23 = sld [smem:[#allocation3 + $0x181]]  ;;  %v185_v13 = vstv %s1830_s5 }
  0x19   :  { %v80_v4 = vld.sshfl [vmem:[#allocation1] sm:$0xff pattern:$0x75316420]  ;;  %v81_v5 = vld.sshfl [vmem:[#allocation1 + $0x8] sm:$0xff pattern:$0x75316420]  ;;  %v182_v12 = vstv %s1828_s3 }
  0x1a   :  { %133 = vst [vmem:[#allocation1] ss:$2 sm:$0xff] %v131_v3  ;;  %1405 = vmatpush.msk.msra.mxu0 %vm86_vm0, %v80_v4  ;;  %1407 = vmatpush.msk.msra.mxu1 %vm86_vm0, %v81_v5  ;;  %s1844_s24 = sld [smem:[#allocation3 + $0x200]]  ;;  %v201_v15 = vstv %s1834_s20 }
  0x1b   :  { %1406 = vmatmul.msk.f32.vlgmr.msra.gmra.mxu0 %vm82_vm1, %v70_v6  ;;  %1408 = vmatmul.msk.f32.vlgmr.msra.gmra.mxu1 %vm82_vm1, %v70_v6  ;;  %s1846_s25 = sld [smem:[#allocation3 + $0x201]]  ;;  %v214_v18 = vstv %s1836_s4 }
  0x1c   :  { %s1848_s26 = sld [smem:[#allocation3 + $0x280]]  ;;  %v217_v19 = vstv %s1838_s21 }
  0x1d   :  { %s1850_s27 = sld [smem:[#allocation3 + $0x281]]  ;;  %v230_v20 = vstv %s1840_s22 }
  0x1e   :  { %s1852_s28 = sld [smem:[#allocation3 + $0x300]]  ;;  %v233_v21 = vstv %s1842_s23 }
  0x1f   :  { %s1854_s29 = sld [smem:[#allocation3 + $0x301]] }
  0x20   :  { %s1856_s30 = sld [smem:[#allocation3 + $0x380]]  ;;  %v246_v22 = vstv %s1844_s24 }
  0x21   :  { %v134_v7 = vld.sshfl [vmem:[#allocation1] sm:$0xff pattern:$0x75316420]  ;;  %v135_v8 = vld.sshfl [vmem:[#allocation1 + $0x8] sm:$0xff pattern:$0x75316420]  ;;  %v249_v23 = vstv %s1846_s25 }
  0x22   :  { %1409 = vmatpush.msk.msra.mxu2 %vm86_vm0, %v134_v7  ;;  %1411 = vmatpush.msk.msra.mxu3 %vm86_vm0, %v135_v8  ;;  %s1858_s13 = sld [smem:[#allocation3 + $0x381]]  ;;  %v262_v24 = vstv %s1848_s26 }
  0x23   :  { %1410 = vmatmul.msk.f32.vlgmr.msra.gmra.mxu2 %vm82_vm1, %v70_v6  ;;  %1412 = vmatmul.msk.f32.vlgmr.msra.gmra.mxu3 %vm82_vm1, %v70_v6  ;;  %s1860_s0 = sld [smem:[#allocation3 + $0x400]]  ;;  %v265_v25 = vstv %s1850_s27 }
  0x24   :  { %s1862_s14 = sld [smem:[#allocation3 + $0x401]]  ;;  %v278_v26 = vstv %s1852_s28 }
  0x25   :  { %s1864_s8 = sld [smem:[#allocation3 + $0x480]]  ;;  %v281_v27 = vstv %s1854_s29 }
  0x26   :  { %s1866_s15 = sld [smem:[#allocation3 + $0x481]]  ;;  %v294_v28 = vstv %s1856_s30 }
  0x27   :  { %s1868_s16 = sld [smem:[#allocation3 + $0x500]] }
  0x28   :  { %s1870_s17 = sld [smem:[#allocation3 + $0x501]]  ;;  %v297_v29 = vstv %s1858_s13 }
  0x29   :  { %s1872_s2 = sld [smem:[#allocation3 + $0x580]]  ;;  %v310_v30 = vstv %s1860_s0 }
  0x2a   :  { %s1876_s18 = sld [smem:[#allocation3 + $0x581]]  ;;  %v313_v31 = vstv %s1862_s14 }
  0x2b   :  { %s1878_s12 = sld [smem:[#allocation3 + $0x600]]  ;;  %v326_v34 = vstv %s1864_s8 }
  0x2c   :  { %s1884_s11 = sld [smem:[#allocation3 + $0x601]]  ;;  %v329_v35 = vstv %s1866_s15 }
  0x2d   :  { %v342_v40 = vstv %s1868_s16  ;;  %s1990_s3 = sld [smem:[#allocation3 + $0x700]] }
  0x2e   :  { %v345_v41 = vstv %s1870_s17  ;;  %s1998_s5 = sld [smem:[#allocation3 + $0x701]] }
  0x2f   :  { %v1917_v42 = vstv %s1872_s2  ;;  %s2200_s19 = sld [smem:[#allocation3 + $0x780]] }
  0x30   :  { %v1920_v43 = vstv %s1876_s18  ;;  %s2210_s20 = sld [smem:[#allocation3 + $0x781]] }
  0x31   :  { %v1925_v46 = vstv %s1878_s12  ;;  %s1970_s12 = sld [smem:[#allocation3 + $0x681]] }
  0x32   :  { %v1928_v47 = vstv %s1884_s11  ;;  %s1960_s11 = sld [smem:[#allocation3 + $0x680]] }
  0x33   :  { %s2422_s4 = sld [smem:[#allocation3]] }
  0x34   :  { %s2432_s21 = sld [smem:[#allocation3 + $0x1]] }
  0x35   :  { %s2440_s22 = sld [smem:[#allocation3 + $0x80]] }
  0x36   :  { %s2445_s23 = sld [smem:[#allocation3 + $0x81]] }
  0x37   :  { %s2454_s24 = sld [smem:[#allocation3 + $0x100]] }
  0x38   :  { %s2461_s25 = sld [smem:[#allocation3 + $0x101]] }
  0x39   :  { %s2470_s26 = sld [smem:[#allocation3 + $0x180]] }
  0x3a   :  { %s2479_s27 = sld [smem:[#allocation3 + $0x181]] }
  0x3b   :  { %s2495_s28 = sld [smem:[#allocation3 + $0x200]] }
  0x3c   :  { %s2500_s29 = sld [smem:[#allocation3 + $0x201]] }
  0x3d   :  { %s2519_s30 = sld [smem:[#allocation3 + $0x280]] }
  0x3e   :  { %s2523_s13 = sld [smem:[#allocation3 + $0x281]] }
  0x3f   :  { %s2528_s0 = sld [smem:[#allocation3 + $0x300]] }
  0x40   :  { %s2543_s14 = sld [smem:[#allocation3 + $0x301]] }
  0x41   :  { %s2556_s8 = sld [smem:[#allocation3 + $0x380]] }
  0x42   :  { %s2563_s15 = sld [smem:[#allocation3 + $0x381]] }
  0x43   :  { %s2582_s16 = sld [smem:[#allocation3 + $0x400]] }
  0x44   :  { %s2594_s17 = sld [smem:[#allocation3 + $0x401]] }
  0x45   :  { %s2602_s2 = sld [smem:[#allocation3 + $0x480]] }
  0x46   :  { %s2620_s18 = sld [smem:[#allocation3 + $0x481]] }
  0x85   :  { %v1874_v9 = vpop.permute.xlu0 %75 }
  0x98   :  { %v108_v10 = vpop.f32.mrf.mxu0  ;;  %v128_v11 = vpop.f32.mrf.mxu1 }
  0x99   :  { %v1887_v16 = vadd.f32 %v108_v10, %v1874_v9  ;;  %v1890_v17 = vadd.f32 %v128_v11, %v1874_v9 }
  0x9b   :  { %v183_v32 = vsub.f32 %v1887_v16, %v182_v12  ;;  %v184_v33 = vsub.f32 %v1890_v17, %v182_v12  ;;  %v199_v36 = vsub.f32 %v1887_v16, %v198_v14  ;;  %v200_v37 = vsub.f32 %v1890_v17, %v198_v14 }
  0x9c   :  { %v215_v38 = vsub.f32 %v1887_v16, %v214_v18  ;;  %v216_v39 = vsub.f32 %v1890_v17, %v214_v18  ;;  %v231_v44 = vsub.f32 %v1887_v16, %v230_v20  ;;  %v232_v45 = vsub.f32 %v1890_v17, %v230_v20 }
  0x9d   :  { %v1930_v48 = vmul.f32 %v183_v32, %v183_v32  ;;  %v1932_v49 = vmul.f32 %v184_v33, %v184_v33  ;;  %v247_v50 = vsub.f32 %v1887_v16, %v246_v22  ;;  %v248_v51 = vsub.f32 %v1890_v17, %v246_v22 }
  0x9e   :  { %v1936_v52 = vmul.f32 %v199_v36, %v199_v36  ;;  %v1938_v53 = vmul.f32 %v200_v37, %v200_v37  ;;  %v1940_v54 = vmul.f32 %v215_v38, %v215_v38  ;;  %v1942_v55 = vmul.f32 %v216_v39, %v216_v39 }
  0x9f   :  { %v263_v56 = vsub.f32 %v1887_v16, %v262_v24  ;;  %v264_v57 = vsub.f32 %v1890_v17, %v262_v24  ;;  %v279_v58 = vsub.f32 %v1887_v16, %v278_v26  ;;  %v280_v59 = vsub.f32 %v1890_v17, %v278_v26 }
  0xa0   :  { %v1948_v60 = vmul.f32 %v231_v44, %v231_v44  ;;  %v1950_v61 = vmul.f32 %v232_v45, %v232_v45  ;;  %v295_v62 = vsub.f32 %v1887_v16, %v294_v28  ;;  %v296_v63 = vsub.f32 %v1890_v17, %v294_v28 }
  0xa1   :  { %v1954_v3 = vmul.f32 %v247_v50, %v247_v50  ;;  %v1956_v4 = vmul.f32 %v248_v51, %v248_v51  ;;  %v311_v5 = vsub.f32 %v1887_v16, %v310_v30  ;;  %v312_v6 = vsub.f32 %v1890_v17, %v310_v30 }
  0xa2   :  { %v327_v10 = vsub.f32 %v1887_v16, %v326_v34  ;;  %v328_v11 = vsub.f32 %v1890_v17, %v326_v34  ;;  %v1972_v12 = vmul.f32 %v263_v56, %v263_v56  ;;  %v1974_v14 = vmul.f32 %v264_v57, %v264_v57 }
  0xa3   :  { %v1976_v18 = vmul.f32 %v279_v58, %v279_v58  ;;  %v1978_v20 = vmul.f32 %v280_v59, %v280_v59  ;;  %v1986_v24 = vmul.f32 %v295_v62, %v295_v62  ;;  %v1988_v26 = vmul.f32 %v296_v63, %v296_v63 }
  0xa4   :  { %v343_v28 = vsub.f32 %v1887_v16, %v342_v40  ;;  %v344_v30 = vsub.f32 %v1890_v17, %v342_v40  ;;  %v359_v32 = vsub.f32 %v1887_v16, %v1917_v42  ;;  %v360_v33 = vsub.f32 %v1890_v17, %v1917_v42 }
  0xa5   :  { %v2002_v34 = vmul.f32 %v312_v6, %v312_v6  ;;  %v2004_v36 = vmul.f32 %v327_v10, %v327_v10  ;;  %v2006_v37 = vmul.f32 %v328_v11, %v328_v11  ;;  %v2043_v62 = vstv %s1960_s11  ;;  %s2628_s11 = sld [smem:[#allocation3 + $0x500]] }
  0xa6   :  { %v157_v0 = vpop.f32.mrf.mxu2  ;;  %v177_v2 = vpop.f32.mrf.mxu3  ;;  %v2026_v57 = vmul.f32 %v343_v28, %v343_v28  ;;  %v2028_v58 = vmul.f32 %v344_v30, %v344_v30  ;;  %v2032_v59 = vmul.f32 %v360_v33, %v360_v33  ;;  %v2046_v63 = vstv %s1970_s12  ;;  %s2649_s12 = sld [smem:[#allocation3 + $0x501]] }
  0xa7   :  { %v1963_v7 = vadd.f32 %v157_v0, %v1874_v9  ;;  %v1966_v8 = vadd.f32 %v177_v2, %v1874_v9  ;;  %v2060_v33 = vstv %s1998_s5 }
  0xa9   :  { %v186_v9 = vsub.f32 %v1963_v7, %v185_v13  ;;  %v187_v22 = vsub.f32 %v1966_v8, %v185_v13  ;;  %v2000_v13 = vmul.f32 %v311_v5, %v311_v5  ;;  %v202_v38 = vsub.f32 %v1963_v7, %v201_v15 }
  0xaa   :  { %v203_v39 = vsub.f32 %v1966_v8, %v201_v15  ;;  %v218_v40 = vsub.f32 %v1963_v7, %v217_v19  ;;  %v219_v44 = vsub.f32 %v1966_v8, %v217_v19  ;;  %v234_v51 = vsub.f32 %v1963_v7, %v233_v21 }
  0xab   :  { %v190_v45 = vmul.f32 %v186_v9, %v186_v9  ;;  %v191_v50 = vmul.f32 %v187_v22, %v187_v22  ;;  %v235_v56 = vsub.f32 %v1966_v8, %v233_v21  ;;  %v2030_v15 = vmul.f32 %v359_v32, %v359_v32 }
  0xac   :  { %v2036_v19 = vsub.f32 %v1887_v16, %v1925_v46  ;;  %v2040_v21 = vsub.f32 %v1890_v17, %v1925_v46  ;;  %v206_v0 = vmul.f32 %v202_v38, %v202_v38  ;;  %v207_v2 = vmul.f32 %v203_v39, %v203_v39 }
  0xad   :  { %v222_v5 = vmul.f32 %v218_v40, %v218_v40  ;;  %v223_v6 = vmul.f32 %v219_v44, %v219_v44  ;;  %v192_v10 = vadd.f32 %v190_v45, %v1930_v48  ;;  %v193_v11 = vadd.f32 %v191_v50, %v1932_v49 }
  0xae   :  { %v238_v9 = vmul.f32 %v234_v51, %v234_v51  ;;  %v239_v22 = vmul.f32 %v235_v56, %v235_v56  ;;  %v250_v28 = vsub.f32 %v1963_v7, %v249_v23  ;;  %v251_v30 = vsub.f32 %v1966_v8, %v249_v23 }
  0xaf   :  { %v2057_v32 = vstv %s1990_s3  ;;  %v266_v38 = vsub.f32 %v1963_v7, %v265_v25  ;;  %v267_v48 = vsub.f32 %v1966_v8, %v265_v25  ;;  %v282_v49 = vsub.f32 %v1963_v7, %v281_v27 }
  0xb0   :  { %v283_v39 = vsub.f32 %v1966_v8, %v281_v27  ;;  %v208_v23 = vadd.f32 %v206_v0, %v1936_v52  ;;  %v209_v40 = vadd.f32 %v207_v2, %v1938_v53  ;;  %v224_v44 = vadd.f32 %v222_v5, %v1940_v54 }
  0xb1   :  { %v225_v45 = vadd.f32 %v223_v6, %v1942_v55  ;;  %v2078_v50 = vmul.f32 -1.0, %v192_v10  ;;  %v2080_v51 = vmul.f32 -1.0, %v193_v11  ;;  %v240_v25 = vadd.f32 %v238_v9, %v1948_v60 }
  0xb2   :  { %v241_v56 = vadd.f32 %v239_v22, %v1950_v61  ;;  %v254_v1 = vmul.f32 %v250_v28, %v250_v28  ;;  %v255_v27 = vmul.f32 %v251_v30, %v251_v30  ;;  %v298_v52 = vsub.f32 %v1963_v7, %v297_v29 }
  0xb3   :  { %v299_v53 = vsub.f32 %v1966_v8, %v297_v29  ;;  %v270_v54 = vmul.f32 %v266_v38, %v266_v38  ;;  %v271_v55 = vmul.f32 %v267_v48, %v267_v48  ;;  %v286_v0 = vmul.f32 %v282_v49, %v282_v49 }
  0xb4   :  { %v287_v2 = vmul.f32 %v283_v39, %v283_v39  ;;  %v2090_v5 = vmul.f32 -1.0, %v208_v23  ;;  %v2092_v60 = vmul.f32 -1.0, %v209_v40  ;;  %v2094_v61 = vmul.f32 -1.0, %v224_v44 }
  0xb5   :  { %v2096_v6 = vmul.f32 -1.0, %v225_v45  ;;  %v2098_v10 = vmul.f32 -1.0, %v240_v25  ;;  %v2100_v11 = vmul.f32 -1.0, %v241_v56  ;;  %v314_v29 = vsub.f32 %v1963_v7, %v313_v31 }
  0xb6   :  { %v315_v9 = vsub.f32 %v1966_v8, %v313_v31  ;;  %v256_v22 = vadd.f32 %v254_v1, %v1954_v3  ;;  %v257_v28 = vadd.f32 %v255_v27, %v1956_v4  ;;  %v302_v30 = vmul.f32 %v298_v52, %v298_v52 }
  0xb7   :  { %v303_v38 = vmul.f32 %v299_v53, %v299_v53  ;;  %v272_v48 = vadd.f32 %v270_v54, %v1972_v12  ;;  %v273_v49 = vadd.f32 %v271_v55, %v1974_v14  ;;  %v288_v39 = vadd.f32 %v286_v0, %v1976_v18 }
  0xb8   :  { %v289_v23 = vadd.f32 %v287_v2, %v1978_v20  ;;  %v330_v40 = vsub.f32 %v1963_v7, %v329_v35  ;;  %v331_v31 = vsub.f32 %v1966_v8, %v329_v35  ;;  %v346_v1 = vsub.f32 %v1963_v7, %v345_v41 }
  0xb9   :  { %v347_v3 = vsub.f32 %v1966_v8, %v345_v41  ;;  %v318_v4 = vmul.f32 %v314_v29, %v314_v29  ;;  %v319_v12 = vmul.f32 %v315_v9, %v315_v9  ;;  %v362_v14 = vsub.f32 %v1963_v7, %v1920_v43 }
  0xba   :  { %v363_v18 = vsub.f32 %v1966_v8, %v1920_v43  ;;  %v2130_v20 = vmul.f32 -1.0, %v256_v22  ;;  %v2132_v44 = vmul.f32 -1.0, %v257_v28  ;;  %v304_v35 = vadd.f32 %v302_v30, %v1986_v24 }
  0xbb   :  { %v305_v45 = vadd.f32 %v303_v38, %v1988_v26  ;;  %v2136_v25 = vmul.f32 -1.0, %v272_v48  ;;  %v2138_v56 = vmul.f32 -1.0, %v273_v49  ;;  %v2140_v41 = vmul.f32 -1.0, %v288_v39 }
  0xbc   :  { %v2142_v27 = vmul.f32 -1.0, %v289_v23  ;;  %v334_v52 = vmul.f32 %v330_v40, %v330_v40  ;;  %v335_v53 = vmul.f32 %v331_v31, %v331_v31  ;;  %v350_v54 = vmul.f32 %v346_v1, %v346_v1 }
  0xbd   :  { %v351_v55 = vmul.f32 %v347_v3, %v347_v3  ;;  %v320_v0 = vadd.f32 %v318_v4, %v2000_v13  ;;  %v321_v2 = vadd.f32 %v319_v12, %v2002_v34  ;;  %v366_v29 = vmul.f32 %v362_v14, %v362_v14 }
  0xbe   :  { %v367_v24 = vmul.f32 %v363_v18, %v363_v18  ;;  %v2146_v9 = vmul.f32 -1.0, %v304_v35  ;;  %v2148_v26 = vmul.f32 -1.0, %v305_v45  ;;  %v378_v22 = vsub.f32 %v1963_v7, %v1928_v47 }
  0xbf   :  { %v379_v28 = vsub.f32 %v1966_v8, %v1928_v47  ;;  %v391_v30 = vsub.f32 %v1887_v16, %v2043_v62  ;;  %v392_v13 = vsub.f32 %v1890_v17, %v2043_v62  ;;  %v394_v34 = vsub.f32 %v1963_v7, %v2046_v63 }
  0xc0   :  { %v395_v38 = vsub.f32 %v1966_v8, %v2046_v63  ;;  %v336_v48 = vadd.f32 %v334_v52, %v2004_v36  ;;  %v337_v49 = vadd.f32 %v335_v53, %v2006_v37  ;;  %v352_v39 = vadd.f32 %v350_v54, %v2026_v57 }
  0xc1   :  { %v353_v23 = vadd.f32 %v351_v55, %v2028_v58  ;;  %v2166_v40 = vmul.f32 -1.0, %v320_v0  ;;  %v2168_v31 = vmul.f32 -1.0, %v321_v2  ;;  %v368_v1 = vadd.f32 %v366_v29, %v2030_v15 }
  0xc2   :  { %v369_v3 = vadd.f32 %v367_v24, %v2032_v59  ;;  %v380_v4 = vmul.f32 %v2036_v19, %v2036_v19  ;;  %v381_v36 = vmul.f32 %v2040_v21, %v2040_v21  ;;  %v382_v12 = vmul.f32 %v378_v22, %v378_v22 }
  0xc3   :  { %v383_v37 = vmul.f32 %v379_v28, %v379_v28  ;;  %v396_v14 = vmul.f32 %v391_v30, %v391_v30  ;;  %v397_v57 = vmul.f32 %v392_v13, %v392_v13  ;;  %v398_v18 = vmul.f32 %v394_v34, %v394_v34 }
  0xc4   :  { %v399_v58 = vmul.f32 %v395_v38, %v395_v38  ;;  %v2176_v35 = vmul.f32 -1.0, %v336_v48  ;;  %v2178_v45 = vmul.f32 -1.0, %v337_v49  ;;  %v407_v15 = vsub.f32 %v1887_v16, %v2057_v32 }
  0xc5   :  { %v408_v59 = vsub.f32 %v1890_v17, %v2057_v32  ;;  %v2184_v19 = vmul.f32 -1.0, %v352_v39  ;;  %v2186_v52 = vmul.f32 -1.0, %v353_v23  ;;  %v2188_v21 = vmul.f32 -1.0, %v368_v1 }
  0xc6   :  { %v2190_v53 = vmul.f32 -1.0, %v369_v3  ;;  %v384_v54 = vadd.f32 %v382_v12, %v380_v4  ;;  %v385_v55 = vadd.f32 %v383_v37, %v381_v36  ;;  %vm436_vm2 = vcmp.gt.f32.partialorder %v2090_v5, %v2078_v50 }
  0xc7   :  { %vm437_vm3 = vcmp.gt.f32.partialorder %v2092_v60, %v2080_v51  ;;  %v400_v0 = vadd.f32 %v398_v18, %v396_v14  ;;  %v401_v2 = vadd.f32 %v399_v58, %v397_v57  ;;  %v410_v29 = vsub.f32 %v1963_v7, %v2060_v33 }
  0xc8   :  { %v411_v24 = vsub.f32 %v1966_v8, %v2060_v33  ;;  %v2202_v22 = vmul.f32 %v407_v15, %v407_v15  ;;  %v2204_v28 = vmul.f32 %v408_v59, %v408_v59  ;;  %v438_v30 = vsel %vm436_vm2, %v2090_v5, %v2078_v50 }
  0xc9   :  { %v439_v13 = vsel %vm437_vm3, %v2092_v60, %v2080_v51  ;;  %v2852_v34 = vmov 0   ;;  %vm442_vm4 = vcmp.gt.f32.partialorder %v2094_v61, %v438_v30  ;;  %v2216_v49 = vmul.f32 -1.0, %v384_v54 }
  0xca   :  { %v440_v38 = vsel %vm436_vm2, 1, %v2852_v34  ;;  %v441_v48 = vsel %vm437_vm3, 1, %v2852_v34  ;;  %vm443_vm5 = vcmp.gt.f32.partialorder %v2096_v6, %v439_v13  ;;  %v2218_v39 = vmul.f32 -1.0, %v385_v55 }
  0xcb   :  { %v444_v23 = vsel %vm442_vm4, %v2094_v61, %v438_v30  ;;  %v445_v1 = vsel %vm443_vm5, %v2096_v6, %v439_v13  ;;  %v446_v3 = vsel %vm442_vm4, 2, %v440_v38  ;;  %v447_v4 = vsel %vm443_vm5, 2, %v441_v48 }
  0xcc   :  { %vm448_vm6 = vcmp.gt.f32.partialorder %v2098_v10, %v444_v23  ;;  %vm449_vm7 = vcmp.gt.f32.partialorder %v2100_v11, %v445_v1  ;;  %v414_v36 = vmul.f32 %v410_v29, %v410_v29  ;;  %v415_v12 = vmul.f32 %v411_v24, %v411_v24 }
  0xcd   :  { %v450_v37 = vsel %vm448_vm6, %v2098_v10, %v444_v23  ;;  %v451_v14 = vsel %vm449_vm7, %v2100_v11, %v445_v1  ;;  %v452_v57 = vsel %vm448_vm6, 3, %v446_v3  ;;  %v453_v18 = vsel %vm449_vm7, 3, %v447_v4 }
  0xce   :  { %vm454_vm8 = vcmp.gt.f32.partialorder %v2130_v20, %v450_v37  ;;  %vm455_vm9 = vcmp.gt.f32.partialorder %v2132_v44, %v451_v14  ;;  %v2230_v55 = vmul.f32 -1.0, %v400_v0  ;;  %v2233_v29 = vstv %s2200_s19 }
  0xcf   :  { %v456_v58 = vsel %vm454_vm8, %v2130_v20, %v450_v37  ;;  %v457_v15 = vsel %vm455_vm9, %v2132_v44, %v451_v14  ;;  %v458_v59 = vsel %vm454_vm8, 4, %v452_v57  ;;  %v459_v54 = vsel %vm455_vm9, 4, %v453_v18 }
  0xd0   :  { %vm460_vm10 = vcmp.gt.f32.partialorder %v2136_v25, %v456_v58  ;;  %vm461_vm11 = vcmp.gt.f32.partialorder %v2138_v56, %v457_v15  ;;  %v2239_v38 = vmul.f32 -1.0, %v401_v2  ;;  %v2242_v48 = vstv %s2210_s20 }
  0xd1   :  { %v462_v24 = vsel %vm460_vm10, %v2136_v25, %v456_v58  ;;  %v463_v30 = vsel %vm461_vm11, %v2138_v56, %v457_v15  ;;  %v464_v13 = vsel %vm460_vm10, 5, %v458_v59  ;;  %v465_v34 = vsel %vm461_vm11, 5, %v459_v54 }
  0xd2   :  { %vm466_vm12 = vcmp.gt.f32.partialorder %v2140_v41, %v462_v24  ;;  %vm467_vm13 = vcmp.gt.f32.partialorder %v2142_v27, %v463_v30  ;;  %v423_v4 = vsub.f32 %v1887_v16, %v2233_v29  ;;  %v424_v37 = vsub.f32 %v1890_v17, %v2233_v29 }
  0xd3   :  { %v468_v0 = vsel %vm466_vm12, %v2140_v41, %v462_v24  ;;  %v469_v23 = vsel %vm467_vm13, %v2142_v27, %v463_v30  ;;  %v470_v1 = vsel %vm466_vm12, 6, %v464_v13  ;;  %v471_v3 = vsel %vm467_vm13, 6, %v465_v34 }
  0xd4   :  { %vm472_vm14 = vcmp.gt.f32.partialorder %v2146_v9, %v468_v0  ;;  %vm473_vm15 = vcmp.gt.f32.partialorder %v2148_v26, %v469_v23  ;;  %v426_v58 = vsub.f32 %v1963_v7, %v2242_v48  ;;  %v427_v15 = vsub.f32 %v1966_v8, %v2242_v48 }
  0xd5   :  { %v474_v2 = vsel %vm472_vm14, %v2146_v9, %v468_v0  ;;  %v475_v14 = vsel %vm473_vm15, %v2148_v26, %v469_v23  ;;  %v476_v57 = vsel %vm472_vm14, 7, %v470_v1  ;;  %v477_v18 = vsel %vm473_vm15, 7, %v471_v3 }
  0xd6   :  { %vm478_vm0 = vcmp.gt.f32.partialorder %v2166_v40, %v474_v2  ;;  %vm479_vm1 = vcmp.gt.f32.partialorder %v2168_v31, %v475_v14  ;;  %v428_v24 = vmul.f32 %v423_v4, %v423_v4  ;;  %v429_v30 = vmul.f32 %v424_v37, %v424_v37 }
  0xd7   :  { %v480_v16 = vsel %vm478_vm0, %v2166_v40, %v474_v2  ;;  %v481_v17 = vsel %vm479_vm1, %v2168_v31, %v475_v14  ;;  %v482_v59 = vsel %vm478_vm0, 8, %v476_v57  ;;  %v483_v54 = vsel %vm479_vm1, 8, %v477_v18 }
  0xd8   :  { %vm484_vm2 = vcmp.gt.f32.partialorder %v2176_v35, %v480_v16  ;;  %vm485_vm3 = vcmp.gt.f32.partialorder %v2178_v45, %v481_v17  ;;  %v430_v0 = vmul.f32 %v426_v58, %v426_v58  ;;  %v431_v23 = vmul.f32 %v427_v15, %v427_v15 }
  0xd9   :  { %v486_v7 = vsel %vm484_vm2, %v2176_v35, %v480_v16  ;;  %v487_v8 = vsel %vm485_vm3, %v2178_v45, %v481_v17  ;;  %v488_v13 = vsel %vm484_vm2, 9, %v482_v59  ;;  %v489_v34 = vsel %vm485_vm3, 9, %v483_v54 }
  0xda   :  { %vm490_vm4 = vcmp.gt.f32.partialorder %v2184_v19, %v486_v7  ;;  %vm491_vm5 = vcmp.gt.f32.partialorder %v2186_v52, %v487_v8  ;;  %v416_v2 = vadd.f32 %v414_v36, %v2202_v22  ;;  %v417_v14 = vadd.f32 %v415_v12, %v2204_v28 }
  0xdb   :  { %v492_v1 = vsel %vm490_vm4, %v2184_v19, %v486_v7  ;;  %v493_v3 = vsel %vm491_vm5, %v2186_v52, %v487_v8  ;;  %v494_v4 = vsel %vm490_vm4, 10, %v488_v13  ;;  %v495_v37 = vsel %vm491_vm5, 10, %v489_v34 }
  0xdc   :  { %vm496_vm6 = vcmp.gt.f32.partialorder %v2188_v21, %v492_v1  ;;  %vm497_vm7 = vcmp.gt.f32.partialorder %v2190_v53, %v493_v3  ;;  %v432_v16 = vadd.f32 %v430_v0, %v428_v24  ;;  %v433_v17 = vadd.f32 %v431_v23, %v429_v30 }
  0xdd   :  { %v498_v57 = vsel %vm496_vm6, %v2188_v21, %v492_v1  ;;  %v499_v18 = vsel %vm497_vm7, %v2190_v53, %v493_v3  ;;  %v500_v58 = vsel %vm496_vm6, 11, %v494_v4  ;;  %v501_v15 = vsel %vm497_vm7, 11, %v495_v37 }
  0xde   :  { %vm502_vm8 = vcmp.gt.f32.partialorder %v2216_v49, %v498_v57  ;;  %vm503_vm9 = vcmp.gt.f32.partialorder %v2218_v39, %v499_v18  ;;  %v2282_v59 = vmul.f32 -1.0, %v416_v2  ;;  %v2284_v54 = vmul.f32 -1.0, %v417_v14 }
  0xdf   :  { %v504_v22 = vsel %vm502_vm8, %v2216_v49, %v498_v57  ;;  %v505_v28 = vsel %vm503_vm9, %v2218_v39, %v499_v18  ;;  %v506_v36 = vsel %vm502_vm8, 12, %v500_v58  ;;  %v507_v12 = vsel %vm503_vm9, 12, %v501_v15 }
  0xe0   :  { %vm508_vm10 = vcmp.gt.f32.partialorder %v2230_v55, %v504_v22  ;;  %vm509_vm11 = vcmp.gt.f32.partialorder %v2239_v38, %v505_v28  ;;  %v2290_v13 = vmul.f32 -1.0, %v432_v16  ;;  %v2292_v34 = vmul.f32 -1.0, %v433_v17 }
  0xe1   :  { %v510_v24 = vsel %vm508_vm10, %v2230_v55, %v504_v22  ;;  %v511_v30 = vsel %vm509_vm11, %v2239_v38, %v505_v28  ;;  %v512_v7 = vsel %vm508_vm10, 13, %v506_v36  ;;  %v513_v8 = vsel %vm509_vm11, 13, %v507_v12 }
  0xe2   :  { %vm514_vm12 = vcmp.gt.f32.partialorder %v2282_v59, %v510_v24  ;;  %vm515_vm13 = vcmp.gt.f32.partialorder %v2284_v54, %v511_v30  ;;  %vm661_vm9 = vcmask 1043456  }
  0xe3   :  { %v516_v0 = vsel %vm514_vm12, %v2282_v59, %v510_v24  ;;  %v517_v23 = vsel %vm515_vm13, %v2284_v54, %v511_v30  ;;  %v518_v1 = vsel %vm514_vm12, 14, %v512_v7  ;;  %v519_v3 = vsel %vm515_vm13, 14, %v513_v8 }
  0xe4   :  { %vm520_vm14 = vcmp.gt.f32.partialorder %v2290_v13, %v516_v0  ;;  %vm521_vm15 = vcmp.gt.f32.partialorder %v2292_v34, %v517_v23 }
  0xe5   :  { %v2301_v4 = vsel %vm520_vm14, %v2290_v13, %v516_v0  ;;  %v2304_v37 = vsel %vm521_vm15, %v2292_v34, %v517_v23  ;;  %v2306_v2 = vsel %vm520_vm14, 15, %v518_v1  ;;  %v2308_v14 = vsel %vm521_vm15, 15, %v519_v3 }
  0xe6   :  { %v526_v57 = vsub.f32 %v2078_v50, %v2301_v4  ;;  %v527_v18 = vsub.f32 %v2080_v51, %v2304_v37  ;;  %v532_v58 = vsub.f32 %v2090_v5, %v2301_v4  ;;  %v533_v15 = vsub.f32 %v2092_v60, %v2304_v37 }
  0xe7   :  { %v538_v28 = vsub.f32 %v2094_v61, %v2301_v4  ;;  %v539_v12 = vsub.f32 %v2096_v6, %v2304_v37  ;;  %v544_v50 = vsub.f32 %v2098_v10, %v2301_v4  ;;  %v545_v51 = vsub.f32 %v2100_v11, %v2304_v37 }
  0xe8   :  { %v528_v16 = vmul.f32 1.442695, %v526_v57  ;;  %v530_v17 = vmul.f32 1.442695, %v527_v18  ;;  %v534_v22 = vmul.f32 1.442695, %v532_v58  ;;  %v550_v60 = vsub.f32 %v2130_v20, %v2301_v4 }
  0xe9   :  { %v536_v36 = vmul.f32 1.442695, %v533_v15  ;;  %v540_v5 = vmul.f32 1.442695, %v538_v28  ;;  %v542_v24 = vmul.f32 1.442695, %v539_v12  ;;  %v551_v61 = vsub.f32 %v2132_v44, %v2304_v37 }
  0xea   :  { %1533 = vpow2.f32 %v528_v16  ;;  %v546_v30 = vmul.f32 1.442695, %v544_v50  ;;  %v556_v6 = vsub.f32 %v2136_v25, %v2301_v4  ;;  %v548_v7 = vmul.f32 1.442695, %v545_v51 }
  0xeb   :  { %1535 = vpow2.f32 %v530_v17  ;;  %v557_v10 = vsub.f32 %v2138_v56, %v2304_v37  ;;  %v552_v11 = vmul.f32 1.442695, %v550_v60  ;;  %v562_v20 = vsub.f32 %v2140_v41, %v2301_v4 }
  0xec   :  { %1537 = vpow2.f32 %v534_v22  ;;  %v554_v23 = vmul.f32 1.442695, %v551_v61  ;;  %v563_v44 = vsub.f32 %v2142_v27, %v2304_v37  ;;  %v558_v25 = vmul.f32 1.442695, %v556_v6 }
  0xed   :  { %1539 = vpow2.f32 %v536_v36  ;;  %v568_v56 = vsub.f32 %v2146_v9, %v2301_v4  ;;  %v560_v57 = vmul.f32 1.442695, %v557_v10  ;;  %v569_v41 = vsub.f32 %v2148_v26, %v2304_v37 }
  0xee   :  { %1541 = vpow2.f32 %v540_v5  ;;  %v564_v18 = vmul.f32 1.442695, %v562_v20  ;;  %v574_v58 = vsub.f32 %v2166_v40, %v2301_v4  ;;  %v566_v27 = vmul.f32 1.442695, %v563_v44 }
  0xef   :  { %1543 = vpow2.f32 %v542_v24  ;;  %v575_v15 = vsub.f32 %v2168_v31, %v2304_v37  ;;  %v570_v17 = vmul.f32 1.442695, %v568_v56  ;;  %v580_v26 = vsub.f32 %v2176_v35, %v2301_v4 }
  0xf0   :  { %v2334_v8 = vpop.eup %1533  ;;  %1545 = vpow2.f32 %v546_v30  ;;  %v572_v40 = vmul.f32 1.442695, %v569_v41  ;;  %v581_v31 = vsub.f32 %v2178_v45, %v2304_v37  ;;  %v576_v50 = vmul.f32 1.442695, %v574_v58 }
  0xf1   :  { %v2338_v0 = vpop.eup %1535  ;;  %1547 = vpow2.f32 %v548_v7  ;;  %v586_v51 = vsub.f32 %v2184_v19, %v2301_v4  ;;  %v578_v60 = vmul.f32 1.442695, %v575_v15  ;;  %v587_v24 = vsub.f32 %v2186_v52, %v2304_v37 }
  0xf2   :  { %v2342_v1 = vpop.eup %1537  ;;  %1549 = vpow2.f32 %v552_v11  ;;  %v582_v30 = vmul.f32 1.442695, %v580_v26  ;;  %v592_v6 = vsub.f32 %v2188_v21, %v2301_v4  ;;  %v584_v10 = vmul.f32 1.442695, %v581_v31 }
  0xf3   :  { %v2346_v3 = vpop.eup %1539  ;;  %1551 = vpow2.f32 %v554_v23  ;;  %v622_v9 = vadd.f32 %v2342_v1, %v2334_v8  ;;  %v593_v11 = vsub.f32 %v2190_v53, %v2304_v37  ;;  %v588_v23 = vmul.f32 1.442695, %v586_v51 }
  0xf4   :  { %v2356_v16 = vpop.eup %1541  ;;  %1553 = vpow2.f32 %v558_v25  ;;  %v623_v22 = vadd.f32 %v2346_v3, %v2338_v0  ;;  %v598_v44 = vsub.f32 %v2216_v49, %v2301_v4  ;;  %v590_v56 = vmul.f32 1.442695, %v587_v24 }
  0xf5   :  { %v2362_v28 = vpop.eup %1543  ;;  %1555 = vpow2.f32 %v560_v57  ;;  %v624_v36 = vadd.f32 %v2356_v16, %v622_v9  ;;  %v599_v57 = vsub.f32 %v2218_v39, %v2304_v37  ;;  %v604_v58 = vsub.f32 %v2230_v55, %v2301_v4 }
  0xf6   :  { %v2367_v12 = vpop.eup %1545  ;;  %1557 = vpow2.f32 %v564_v18  ;;  %v625_v35 = vadd.f32 %v2362_v28, %v623_v22  ;;  %v594_v18 = vmul.f32 1.442695, %v592_v6  ;;  %v596_v15 = vmul.f32 1.442695, %v593_v11 }
  0xf7   :  { %v2372_v5 = vpop.eup %1547  ;;  %1559 = vpow2.f32 %v566_v27  ;;  %v626_v45 = vadd.f32 %v2367_v12, %v624_v36  ;;  %v605_v9 = vsub.f32 %v2239_v38, %v2304_v37  ;;  %v600_v26 = vmul.f32 1.442695, %v598_v44 }
  0xf8   :  { %v2377_v61 = vpop.eup %1549  ;;  %1561 = vpow2.f32 %v570_v17  ;;  %v627_v19 = vadd.f32 %v2372_v5, %v625_v35  ;;  %v610_v22 = vsub.f32 %v2282_v59, %v2301_v4  ;;  %v602_v31 = vmul.f32 1.442695, %v599_v57 }
  0xf9   :  { %v2382_v7 = vpop.eup %1551  ;;  %1563 = vpow2.f32 %v572_v40  ;;  %v628_v52 = vadd.f32 %v2377_v61, %v626_v45  ;;  %v611_v36 = vsub.f32 %v2284_v54, %v2304_v37  ;;  %v606_v51 = vmul.f32 1.442695, %v604_v58 }
  0xfa   :  { %v2387_v20 = vpop.eup %1553  ;;  %1565 = vpow2.f32 %v576_v50  ;;  %v629_v21 = vadd.f32 %v2382_v7, %v627_v19  ;;  %v616_v35 = vsub.f32 %v2290_v13, %v2301_v4  ;;  %v608_v24 = vmul.f32 1.442695, %v605_v9 }
  0xfb   :  { %v2392_v25 = vpop.eup %1555  ;;  %1567 = vpow2.f32 %v578_v60  ;;  %v630_v53 = vadd.f32 %v2387_v20, %v628_v52  ;;  %v617_v54 = vsub.f32 %v2292_v34, %v2304_v37  ;;  %v612_v6 = vmul.f32 1.442695, %v610_v22 }
  0xfc   :  { %v2397_v41 = vpop.eup %1557  ;;  %1569 = vpow2.f32 %v582_v30  ;;  %v631_v49 = vadd.f32 %v2392_v25, %v629_v21  ;;  %v614_v4 = vmul.f32 1.442695, %v611_v36  ;;  %v618_v34 = vmul.f32 1.442695, %v616_v35 }
  0xfd   :  { %v2402_v27 = vpop.eup %1559  ;;  %1571 = vpow2.f32 %v584_v10  ;;  %v632_v39 = vadd.f32 %v2397_v41, %v630_v53  ;;  %vm949_vm0 = vcmp.eq.s32.totalorder %v2306_v2, 0  ;;  %vm950_vm1 = vcmp.eq.s32.totalorder %v2308_v14, 0 }
  0xfe   :  { %v2407_v17 = vpop.eup %1561  ;;  %1573 = vpow2.f32 %v588_v23  ;;  %v633_v55 = vadd.f32 %v2402_v27, %v631_v49  ;;  %v620_v23 = vmul.f32 1.442695, %v617_v54  ;;  %v952_v49 = vstv %s2422_s4 }
  0xff   :  { %v2412_v40 = vpop.eup %1563  ;;  %1575 = vpow2.f32 %v590_v56  ;;  %v634_v38 = vadd.f32 %v2407_v17, %v632_v39  ;;  %v956_v22 = vstv %s2432_s21  ;;  %v953_v36 = vsel %vm949_vm0, %v952_v49, 0.0 }
 0x100   :  { %v2417_v50 = vpop.eup %1565  ;;  %1577 = vpow2.f32 %v594_v18  ;;  %v635_v59 = vadd.f32 %v2412_v40, %v633_v55  ;;  %vm959_vm2 = vcmp.eq.s32.totalorder %v2306_v2, 1  ;;  %vm960_vm3 = vcmp.eq.s32.totalorder %v2308_v14, 1 }
 0x101   :  { %v2424_v60 = vpop.eup %1567  ;;  %1579 = vpow2.f32 %v596_v15  ;;  %v636_v45 = vadd.f32 %v2417_v50, %v634_v38  ;;  %v954_v38 = vsel %vm950_vm1, %v952_v49, 0.0  ;;  %vm969_vm4 = vcmp.eq.s32.totalorder %v2306_v2, 2 }
 0x102   :  { %v2429_v30 = vpop.eup %1569  ;;  %1581 = vpow2.f32 %v600_v26  ;;  %v637_v19 = vadd.f32 %v2424_v60, %v635_v59  ;;  %v962_v59 = vstv %s2440_s22  ;;  %vm970_vm5 = vcmp.eq.s32.totalorder %v2308_v14, 2 }
 0x103   :  { %v2434_v13 = vpop.eup %1571  ;;  %1583 = vpow2.f32 %v602_v31  ;;  %v638_v10 = vadd.f32 %v2429_v30, %v636_v45  ;;  %v957_v45 = vsel %vm949_vm0, %v956_v22, 0.0  ;;  %vm979_vm6 = vcmp.eq.s32.totalorder %v2306_v2, 3 }
 0x104   :  { %v2437_v11 = vpop.eup %1573  ;;  %1585 = vpow2.f32 %v606_v51  ;;  %v639_v37 = vadd.f32 %v2434_v13, %v637_v19  ;;  %v966_v19 = vstv %s2445_s23  ;;  %vm980_vm7 = vcmp.eq.s32.totalorder %v2308_v14, 3 }
 0x105   :  { %v2442_v52 = vpop.eup %1575  ;;  %1587 = vpow2.f32 %v608_v24  ;;  %v640_v44 = vadd.f32 %v2437_v11, %v638_v10  ;;  %vm989_vm8 = vcmp.eq.s32.totalorder %v2306_v2, 4  ;;  %vm990_vm10 = vcmp.eq.s32.totalorder %v2308_v14, 4 }
 0x106   :  { %v2447_v21 = vpop.eup %1577  ;;  %1589 = vpow2.f32 %v612_v6  ;;  %v641_v56 = vadd.f32 %v2442_v52, %v639_v37  ;;  %v958_v6 = vsel %vm950_vm1, %v956_v22, 0.0  ;;  %v982_v22 = vstv %s2470_s26 }
 0x107   :  { %v2450_v57 = vpop.eup %1579  ;;  %1591 = vpow2.f32 %v614_v4  ;;  %v642_v53 = vadd.f32 %v2447_v21, %v640_v44  ;;  %v964_v44 = vsel %vm960_vm3, %v962_v59, %v954_v38  ;;  %v968_v49 = vsel %vm960_vm3, %v966_v19, %v958_v6 }
 0x108   :  { %v2456_v18 = vpop.eup %1581  ;;  %1593 = vpow2.f32 %v618_v34  ;;  %v643_v58 = vadd.f32 %v2450_v57, %v641_v56  ;;  %v972_v56 = vstv %s2454_s24  ;;  %vm999_vm11 = vcmp.eq.s32.totalorder %v2306_v2, 5 }
 0x109   :  { %v2463_v15 = vpop.eup %1583  ;;  %1595 = vpow2.f32 %v620_v23  ;;  %v644_v9 = vadd.f32 %v2456_v18, %v642_v53  ;;  %v963_v23 = vsel %vm959_vm2, %v962_v59, %v953_v36  ;;  %vm1000_vm12 = vcmp.eq.s32.totalorder %v2308_v14, 5 }
 0x10a   :  { %v2466_v39 = vpop.eup %1585  ;;  %v645_v26 = vadd.f32 %v2463_v15, %v643_v58  ;;  %v967_v58 = vsel %vm959_vm2, %v966_v19, %v957_v45  ;;  %vm1009_vm13 = vcmp.eq.s32.totalorder %v2306_v2, 6  ;;  %vm1010_vm14 = vcmp.eq.s32.totalorder %v2308_v14, 6 }
 0x10b   :  { %v2472_v55 = vpop.eup %1587  ;;  %v646_v31 = vadd.f32 %v2466_v39, %v644_v9  ;;  %v976_v9 = vstv %s2461_s25  ;;  %vm1019_vm15 = vcmp.eq.s32.totalorder %v2306_v2, 7  ;;  %vm1020_vm0 = vcmp.eq.s32.totalorder %v2308_v14, 7 }
 0x10c   :  { %v2481_v51 = vpop.eup %1589  ;;  %v647_v35 = vadd.f32 %v2472_v55, %v645_v26  ;;  %v973_v26 = vsel %vm969_vm4, %v972_v56, %v963_v23  ;;  %v977_v36 = vsel %vm969_vm4, %v976_v9, %v967_v58  ;;  %v978_v38 = vsel %vm970_vm5, %v976_v9, %v968_v49 }
 0x10d   :  { %v2487_v24 = vpop.eup %1591  ;;  %v648_v54 = vadd.f32 %v2481_v51, %v646_v31  ;;  %v974_v31 = vsel %vm970_vm5, %v972_v56, %v964_v44  ;;  %v983_v59 = vsel %vm979_vm6, %v982_v22, %v973_v26  ;;  %vm1029_vm1 = vcmp.eq.s32.totalorder %v2306_v2, 8 }
 0x10e   :  { %v2497_v4 = vpop.eup %1593  ;;  %v649_v10 = vadd.f32 %v2487_v24, %v647_v35  ;;  %v986_v35 = vstv %s2479_s27  ;;  %v984_v45 = vsel %vm980_vm7, %v982_v22, %v974_v31  ;;  %vm1030_vm2 = vcmp.eq.s32.totalorder %v2308_v14, 8 }
 0x10f   :  { %v2502_v34 = vpop.eup %1595  ;;  %v650_v37 = vadd.f32 %v2497_v4, %v648_v54  ;;  %v992_v54 = vstv %s2495_s28  ;;  %v987_v6 = vsel %vm979_vm6, %v986_v35, %v977_v36  ;;  %v988_v19 = vsel %vm980_vm7, %v986_v35, %v978_v38 }
 0x110   :  { %v651_v53 = vadd.f32 %v2502_v34, %v649_v10  ;;  %v996_v10 = vstv %s2500_s29  ;;  %v993_v56 = vsel %vm989_vm8, %v992_v54, %v983_v59  ;;  %v994_v58 = vsel %vm990_vm10, %v992_v54, %v984_v45 }
 0x111   :  { %1597 = vrcp.f32 %v650_v37  ;;  %v997_v49 = vsel %vm989_vm8, %v996_v10, %v987_v6  ;;  %v998_v9 = vsel %vm990_vm10, %v996_v10, %v988_v19  ;;  %v1002_v36 = vstv %s2519_s30 }
 0x112   :  { %1599 = vrcp.f32 %v651_v53  ;;  %v1006_v54 = vstv %s2523_s13  ;;  %vm1039_vm3 = vcmp.eq.s32.totalorder %v2306_v2, 9  ;;  %vm1040_vm4 = vcmp.eq.s32.totalorder %v2308_v14, 9 }
 0x113   :  { %vm1049_vm5 = vcmp.eq.s32.totalorder %v2306_v2, 10  ;;  %vm1050_vm6 = vcmp.eq.s32.totalorder %v2308_v14, 10  ;;  %vm1059_vm7 = vcmp.eq.s32.totalorder %v2306_v2, 11  ;;  %vm1060_vm8 = vcmp.eq.s32.totalorder %v2308_v14, 11 }
 0x114   :  { %vm1069_vm10 = vcmp.eq.s32.totalorder %v2306_v2, 12 }
 0x117   :  { %v1598_v37 = vpop.eup %1597 }
 0x118   :  { %v1600_v23 = vpop.eup %1599  ;;  %v2531_v44 = vmul.f32 0.0009765625, %v1598_v37  ;;  %v1012_v37 = vstv %s2528_s0 }
 0x119   :  { %v2534_v53 = vmul.f32 0.0009765625, %v1600_v23 }
 0x11a   :  { %v714_v26 = vmul.f32 %v2367_v12, %v2531_v44  ;;  %v678_v22 = vmul.f32 %v2342_v1, %v2531_v44  ;;  %v659_v31 = vmul.f32 %v2334_v8, %v2531_v44  ;;  %v732_v23 = vmul.f32 %v2377_v61, %v2531_v44 }
 0x11b   :  { %v715_v38 = vmul.f32 %v2372_v5, %v2534_v53  ;;  %v679_v35 = vmul.f32 %v2346_v3, %v2534_v53  ;;  %v660_v59 = vmul.f32 %v2338_v0, %v2534_v53  ;;  %v1003_v0 = vsel %vm999_vm11, %v1002_v36, %v993_v56 }
 0x11c   :  { %v716_v1 = vsel %vm661_vm9, %v714_v26, 0.0  ;;  %v680_v12 = vsel %vm661_vm9, %v678_v22, 0.0  ;;  %v662_v8 = vsel %vm661_vm9, %v659_v31, 0.0  ;;  %v733_v26 = vmul.f32 %v2382_v7, %v2534_v53 }
 0x11d   :  { %v717_v5 = vsel %vm661_vm9, %v715_v38, 0.0  ;;  %v681_v45 = vsel %vm661_vm9, %v679_v35, 0.0  ;;  %v663_v3 = vsel %vm661_vm9, %v660_v59, 0.0  ;;  %v696_v22 = vmul.f32 %v2356_v16, %v2531_v44 }
 0x11e   :  { %v718_v6 = vadd.f32 %v717_v5, %v716_v1  ;;  %v682_v19 = vadd.f32 %v681_v45, %v680_v12  ;;  %v664_v10 = vadd.f32 %v663_v3, %v662_v8  ;;  %v697_v31 = vmul.f32 %v2362_v28, %v2534_v53 }
 0x11f   :  { %v930_v56 = vmul.f32 %v2497_v4, %v2531_v44  ;;  %v931_v38 = vmul.f32 %v2502_v34, %v2534_v53  ;;  %v1004_v61 = vsel %vm1000_vm12, %v1002_v36, %v994_v58  ;;  %v1007_v7 = vsel %vm999_vm11, %v1006_v54, %v997_v49 }
 0x120   :  { %719 = vadd.xlane.f32.xlu2 %v718_v6  ;;  %683 = vadd.xlane.f32.xlu1 %v682_v19  ;;  %v1008_v16 = vsel %vm1000_vm12, %v1006_v54, %v998_v9  ;;  %v1013_v28 = vsel %vm1009_vm13, %v1012_v37, %v1003_v0  ;;  %v1016_v4 = vstv %s2543_s14  ;;  %v734_v34 = vsel %vm661_vm9, %v732_v23, 0.0 }
 0x121   :  { %665 = vadd.xlane.f32.xlu0 %v664_v10  ;;  %v735_v58 = vsel %vm661_vm9, %v733_v26, 0.0  ;;  %v698_v36 = vsel %vm661_vm9, %v696_v22, 0.0  ;;  %v699_v49 = vsel %vm661_vm9, %v697_v31, 0.0  ;;  %v932_v9 = vsel %vm661_vm9, %v930_v56, 0.0 }
 0x122   :  { %v933_v35 = vsel %vm661_vm9, %v931_v38, 0.0  ;;  %v1014_v59 = vsel %vm1010_vm14, %v1012_v37, %v1004_v61  ;;  %v1022_v1 = vstv %s2556_s8  ;;  %v1017_v12 = vsel %vm1009_vm13, %v1016_v4, %v1007_v7 }
 0x123   :  { %v1018_v8 = vsel %vm1010_vm14, %v1016_v4, %v1008_v16  ;;  %v1026_v54 = vstv %s2563_s15  ;;  %v736_v5 = vadd.f32 %v735_v58, %v734_v34  ;;  %v700_v45 = vadd.f32 %v699_v49, %v698_v36 }
 0x124   :  { %v768_v3 = vmul.f32 %v2397_v41, %v2531_v44  ;;  %v769_v0 = vmul.f32 %v2402_v27, %v2534_v53  ;;  %v934_v6 = vadd.f32 %v933_v35, %v932_v9  ;;  %v750_v19 = vmul.f32 %v2387_v20, %v2531_v44 }
 0x125   :  { %v751_v10 = vmul.f32 %v2392_v25, %v2534_v53  ;;  %v1023_v37 = vsel %vm1019_vm15, %v1022_v1, %v1013_v28  ;;  %v1024_v23 = vsel %vm1020_vm0, %v1022_v1, %v1014_v59  ;;  %v1027_v41 = vsel %vm1019_vm15, %v1026_v54, %v1017_v12 }
 0x126   :  { %v1028_v27 = vsel %vm1020_vm0, %v1026_v54, %v1018_v8  ;;  %v858_v26 = vmul.f32 %v2447_v21, %v2531_v44  ;;  %v859_v20 = vmul.f32 %v2450_v57, %v2534_v53  ;;  %v912_v25 = vmul.f32 %v2481_v51, %v2531_v44 }
 0x127   :  { %v1032_v22 = vstv %s2582_s16  ;;  %v770_v31 = vsel %vm661_vm9, %v768_v3, 0.0  ;;  %v771_v56 = vsel %vm661_vm9, %v769_v0, 0.0  ;;  %v913_v38 = vmul.f32 %v2487_v24, %v2534_v53 }
 0x128   :  { %737 = vadd.xlane.f32.xlu2 %v736_v5  ;;  %701 = vadd.xlane.f32.xlu1 %v700_v45  ;;  %v894_v21 = vmul.f32 %v2466_v39, %v2531_v44  ;;  %v752_v57 = vsel %vm661_vm9, %v750_v19, 0.0  ;;  %v753_v51 = vsel %vm661_vm9, %v751_v10, 0.0  ;;  %v860_v61 = vsel %vm661_vm9, %v858_v26, 0.0 }
 0x129   :  { %935 = vadd.xlane.f32.xlu0 %v934_v6  ;;  %v861_v7 = vsel %vm661_vm9, %v859_v20, 0.0  ;;  %v914_v28 = vsel %vm661_vm9, %v912_v25, 0.0  ;;  %v915_v24 = vsel %vm661_vm9, %v913_v38, 0.0  ;;  %v1036_v4 = vstv %s2594_s17 }
 0x12a   :  { %v2634_v16 = vadd.f32 %v861_v7, %v860_v61  ;;  %v2639_v34 = vadd.f32 %v915_v24, %v914_v28  ;;  %v895_v39 = vmul.f32 %v2472_v55, %v2534_v53  ;;  %v896_v58 = vsel %vm661_vm9, %v894_v21, 0.0 }
 0x12b   :  { %v1033_v36 = vsel %vm1029_vm1, %v1032_v22, %v1023_v37  ;;  %v772_v49 = vadd.f32 %v771_v56, %v770_v31  ;;  %v754_v9 = vadd.f32 %v753_v51, %v752_v57  ;;  %v804_v35 = vmul.f32 %v2417_v50, %v2531_v44 }
 0x12c   :  { %v1042_v59 = vstv %s2602_s2  ;;  %v805_v1 = vmul.f32 %v2424_v60, %v2534_v53  ;;  %v786_v55 = vmul.f32 %v2407_v17, %v2531_v44  ;;  %v787_v12 = vmul.f32 %v2412_v40, %v2534_v53 }
 0x12d   :  { %v897_v8 = vsel %vm661_vm9, %v895_v39, 0.0  ;;  %v1034_v50 = vsel %vm1030_vm2, %v1032_v22, %v1024_v23  ;;  %v1037_v5 = vsel %vm1029_vm1, %v1036_v4, %v1027_v41  ;;  %v1038_v60 = vsel %vm1030_vm2, %v1036_v4, %v1028_v27 }
 0x12e   :  { %v2658_v54 = vadd.f32 %v897_v8, %v896_v58  ;;  %v1043_v17 = vsel %vm1039_vm3, %v1042_v59, %v1033_v36  ;;  %v1046_v45 = vstv %s2620_s18  ;;  %v1052_v3 = vstv %s2628_s11 }
 0x12f   :  { %v806_v40 = vsel %vm661_vm9, %v804_v35, 0.0  ;;  %v807_v0 = vsel %vm661_vm9, %v805_v1, 0.0  ;;  %v788_v6 = vsel %vm661_vm9, %v786_v55, 0.0  ;;  %v789_v19 = vsel %vm661_vm9, %v787_v12, 0.0 }
 0x130   :  { %773 = vadd.xlane.f32.xlu2 %v772_v49  ;;  %755 = vadd.xlane.f32.xlu1 %v754_v9  ;;  %v1044_v10 = vsel %vm1040_vm4, %v1042_v59, %v1034_v50  ;;  %v1047_v37 = vsel %vm1039_vm3, %v1046_v45, %v1037_v5  ;;  %v1048_v23 = vsel %vm1040_vm4, %v1046_v45, %v1038_v60  ;;  %v1056_v20 = vstv %s2649_s12 }
 0x131   :  { %v808_v41 = vadd.f32 %v807_v0, %v806_v40  ;;  %v790_v27 = vadd.f32 %v789_v19, %v788_v6  ;;  %v1053_v26 = vsel %vm1049_vm5, %v1052_v3, %v1043_v17  ;;  %v840_v25 = vmul.f32 %v2437_v11, %v2531_v44 }
 0x132   :  { %v841_v22 = vmul.f32 %v2442_v52, %v2534_v53  ;;  %v822_v31 = vmul.f32 %v2429_v30, %v2531_v44  ;;  %v823_v56 = vmul.f32 %v2434_v13, %v2534_v53  ;;  %v1054_v38 = vsel %vm1050_vm6, %v1052_v3, %v1044_v10 }
 0x133   :  { %v1057_v21 = vsel %vm1049_vm5, %v1056_v20, %v1047_v37  ;;  %v1058_v57 = vsel %vm1050_vm6, %v1056_v20, %v1048_v23  ;;  %v1063_v11 = vsel %vm1059_vm7, %v1917_v42, %v1053_v26  ;;  %v842_v52 = vsel %vm661_vm9, %v840_v25, 0.0 }
 0x134   :  { %v843_v30 = vsel %vm661_vm9, %v841_v22, 0.0  ;;  %v824_v51 = vsel %vm661_vm9, %v822_v31, 0.0  ;;  %v825_v13 = vsel %vm661_vm9, %v823_v56, 0.0  ;;  %v1064_v61 = vsel %vm1060_vm8, %v1917_v42, %v1054_v38 }
 0x135   :  { %v1067_v7 = vsel %vm1059_vm7, %v1920_v43, %v1057_v21  ;;  %v1068_v28 = vsel %vm1060_vm8, %v1920_v43, %v1058_v57  ;;  %vm1070_vm11 = vcmp.eq.s32.totalorder %v2308_v14, 12  ;;  %v844_v24 = vadd.f32 %v843_v30, %v842_v52 }
 0x136   :  { %v826_v4 = vadd.f32 %v825_v13, %v824_v51  ;;  %v876_v39 = vmul.f32 %v2456_v18, %v2531_v44  ;;  %v1073_v58 = vsel %vm1069_vm10, %v1925_v46, %v1063_v11  ;;  %v877_v36 = vmul.f32 %v2463_v15, %v2534_v53 }
 0x137   :  { %v1074_v42 = vsel %vm1070_vm11, %v1925_v46, %v1064_v61  ;;  %v1077_v49 = vsel %vm1069_vm10, %v1928_v47, %v1067_v7  ;;  %v1078_v43 = vsel %vm1070_vm11, %v1928_v47, %v1068_v28  ;;  %vm1079_vm12 = vcmp.eq.s32.totalorder %v2306_v2, 13 }
 0x138   :  { %809 = vadd.xlane.f32.xlu2 %v808_v41  ;;  %791 = vadd.xlane.f32.xlu1 %v790_v27  ;;  %vm1080_vm13 = vcmp.eq.s32.totalorder %v2308_v14, 13  ;;  %v1083_v9 = vsel %vm1079_vm12, %v2043_v62, %v1073_v58  ;;  %v1087_v44 = vsel %vm1079_vm12, %v2046_v63, %v1077_v49  ;;  %v878_v46 = vsel %vm661_vm9, %v876_v39, 0.0 }
 0x139   :  { %v1084_v18 = vsel %vm1080_vm13, %v2043_v62, %v1074_v42  ;;  %v1088_v15 = vsel %vm1080_vm13, %v2046_v63, %v1078_v43  ;;  %v879_v53 = vsel %vm661_vm9, %v877_v36, 0.0  ;;  %vm1089_vm14 = vcmp.eq.s32.totalorder %v2306_v2, 14 }
 0x13a   :  { %vm1090_vm15 = vcmp.eq.s32.totalorder %v2308_v14, 14  ;;  %v1093_v47 = vsel %vm1089_vm14, %v2057_v32, %v1083_v9  ;;  %v1097_v59 = vsel %vm1089_vm14, %v2060_v33, %v1087_v44  ;;  %v880_v1 = vadd.f32 %v879_v53, %v878_v46 }
 0x13b   :  { %v1094_v35 = vsel %vm1090_vm15, %v2057_v32, %v1084_v18  ;;  %v1098_v62 = vsel %vm1090_vm15, %v2060_v33, %v1088_v15  ;;  %vm1099_vm0 = vcmp.eq.s32.totalorder %v2306_v2, 15  ;;  %vm1100_vm1 = vcmp.eq.s32.totalorder %v2308_v14, 15 }
 0x13c   :  { %v2719_v63 = vsel %vm1099_vm0, %v2233_v29, %v1093_v47  ;;  %v2723_v55 = vsel %vm1100_vm1, %v2233_v29, %v1094_v35  ;;  %v2726_v32 = vsel %vm1099_vm0, %v2242_v48, %v1097_v59  ;;  %v2729_v12 = vsel %vm1100_vm1, %v2242_v48, %v1098_v62 }
 0x13d   :  { %v1109_v33 = vmul.f32 %v2719_v63, %v2719_v63  ;;  %v1110_v2 = vmul.f32 %v2723_v55, %v2723_v55  ;;  %v1111_v14 = vmul.f32 %v2726_v32, %v2726_v32 }
 0x13f   :  { %v1113_v29 = vadd.f32 %v1111_v14, %v1109_v33 }
 0x140   :  { %845 = vadd.xlane.f32.xlu2 %v844_v24  ;;  %827 = vadd.xlane.f32.xlu1 %v826_v4 }
 0x141   :  { %v1115_v48 = vsel %vm661_vm9, %v1113_v29, 0.0 }
 0x148   :  { %881 = vadd.xlane.f32.xlu2 %v880_v1  ;;  %863 = vadd.xlane.f32.xlu1 %v2634_v16  ;;  %v1112_v16 = vmul.f32 %v2729_v12, %v2729_v12 }
 0x14a   :  { %v1114_v8 = vadd.f32 %v1112_v16, %v1110_v2 }
 0x14c   :  { %v1116_v50 = vsel %vm661_vm9, %v1114_v8, 0.0 }
 0x14d   :  { %v1117_v5 = vadd.f32 %v1116_v50, %v1115_v48 }
 0x150   :  { %917 = vadd.xlane.f32.xlu2 %v2639_v34  ;;  %899 = vadd.xlane.f32.xlu1 %v2658_v54 }
 0x158   :  { %1118 = vadd.xlane.f32.xlu1 %v1117_v5 }
 0x193   :  { %v720_v60 = vpop.xlane.xlu2 %719  ;;  %v684_v17 = vpop.xlane.xlu1 %683 }
 0x194   :  { %v721_v45 = vrot.slane %v720_v60, 4  ;;  %v685_v3 = vrot.slane %v684_v17, 4  ;;  %v666_v40 = vpop.xlane.xlu0 %665 }
 0x195   :  { %v667_v0 = vrot.slane %v666_v40, 4 }
 0x196   :  { %v686_v6 = vadd.f32 %v685_v3, %v684_v17  ;;  %v722_v19 = vadd.f32 %v721_v45, %v720_v60 }
 0x197   :  { %v668_v10 = vadd.f32 %v667_v0, %v666_v40 }
 0x198   :  { %v687_v37 = vrot.slane %v686_v6, 2  ;;  %v723_v41 = vrot.slane %v722_v19, 2 }
 0x199   :  { %v669_v23 = vrot.slane %v668_v10, 2 }
 0x19a   :  { %v688_v34 = vadd.f32 %v687_v37, %v686_v6  ;;  %v724_v11 = vadd.f32 %v723_v41, %v722_v19 }
 0x19b   :  { %v738_v54 = vpop.xlane.xlu2 %737  ;;  %v702_v27 = vpop.xlane.xlu1 %701  ;;  %v670_v26 = vadd.f32 %v669_v23, %v668_v10 }
 0x19c   :  { %v739_v20 = vrot.slane %v738_v54, 4  ;;  %v703_v25 = vrot.slane %v702_v27, 4  ;;  %v689_v22 = vrot.slane %v688_v34, 1  ;;  %v725_v28 = vrot.slane %v724_v11, 1  ;;  %v936_v37 = vpop.xlane.xlu0 %935 }
 0x19d   :  { %v671_v31 = vrot.slane %v670_v26, 1 }
 0x19e   :  { %v740_v56 = vadd.f32 %v739_v20, %v738_v54  ;;  %v704_v38 = vadd.f32 %v703_v25, %v702_v27  ;;  %v690_v21 = vadd.f32 %v689_v22, %v688_v34  ;;  %v726_v9 = vadd.f32 %v725_v28, %v724_v11 }
 0x19f   :  { %v672_v57 = vadd.f32 %v671_v31, %v670_v26  ;;  %v937_v27 = vrot.slane %v936_v37, 4 }
 0x1a0   :  { %v741_v52 = vrot.slane %v740_v56, 2  ;;  %v705_v30 = vrot.slane %v704_v38, 2 }
 0x1a1   :  { %1487 = vpush %v672_v57 }
 0x1a2   :  { %1489 = vpush %v690_v21  ;;  %v706_v51 = vadd.f32 %v705_v30, %v704_v38  ;;  %v742_v13 = vadd.f32 %v741_v52, %v740_v56  ;;  %v938_v52 = vadd.f32 %v937_v27, %v936_v37 }
 0x1a3   :  { %v774_v61 = vpop.xlane.xlu2 %773  ;;  %v756_v7 = vpop.xlane.xlu1 %755 }
 0x1a4   :  { %v775_v24 = vrot.slane %v774_v61, 4  ;;  %v757_v4 = vrot.slane %v756_v7, 4  ;;  %v707_v39 = vrot.slane %v706_v51, 1  ;;  %v743_v58 = vrot.slane %v742_v13, 1 }
 0x1a6   :  { %v776_v36 = vadd.f32 %v775_v24, %v774_v61  ;;  %v758_v42 = vadd.f32 %v757_v4, %v756_v7  ;;  %v708_v49 = vadd.f32 %v707_v39, %v706_v51  ;;  %v744_v43 = vadd.f32 %v743_v58, %v742_v13 }
 0x1a7   :  { %v939_v7 = vrot.slane %v938_v52, 2 }
 0x1a8   :  { %v777_v18 = vrot.slane %v776_v36, 2  ;;  %v759_v44 = vrot.slane %v758_v42, 2  ;;  %1491 = vpush %v708_v49 }
 0x1a9   :  { %1493 = vpush %v726_v9 }
 0x1aa   :  { %1495 = vpush %v744_v43  ;;  %v760_v15 = vadd.f32 %v759_v44, %v758_v42  ;;  %v778_v46 = vadd.f32 %v777_v18, %v776_v36  ;;  %v940_v18 = vadd.f32 %v939_v7, %v938_v52 }
 0x1ab   :  { %v810_v53 = vpop.xlane.xlu2 %809  ;;  %v792_v47 = vpop.xlane.xlu1 %791 }
 0x1ac   :  { %v811_v35 = vrot.slane %v810_v53, 4  ;;  %v793_v59 = vrot.slane %v792_v47, 4  ;;  %v761_v62 = vrot.slane %v760_v15, 1  ;;  %v779_v1 = vrot.slane %v778_v46, 1 }
 0x1ae   :  { %v812_v33 = vadd.f32 %v811_v35, %v810_v53  ;;  %v794_v2 = vadd.f32 %v793_v59, %v792_v47  ;;  %v762_v14 = vadd.f32 %v761_v62, %v760_v15  ;;  %v780_v16 = vadd.f32 %v779_v1, %v778_v46 }
 0x1af   :  { %v941_v1 = vrot.slane %v940_v18, 1 }
 0x1b0   :  { %v813_v29 = vrot.slane %v812_v33, 2  ;;  %v795_v8 = vrot.slane %v794_v2, 2  ;;  %1497 = vpush %v762_v14 }
 0x1b1   :  { %1499 = vpush %v780_v16 }
 0x1b2   :  { %v796_v48 = vadd.f32 %v795_v8, %v794_v2  ;;  %v814_v50 = vadd.f32 %v813_v29, %v812_v33  ;;  %v942_v29 = vadd.f32 %v941_v1, %v940_v18 }
 0x1b3   :  { %v846_v5 = vpop.xlane.xlu2 %845  ;;  %v828_v60 = vpop.xlane.xlu1 %827 }
 0x1b4   :  { %v847_v17 = vrot.slane %v846_v5, 4  ;;  %v829_v45 = vrot.slane %v828_v60, 4  ;;  %v797_v3 = vrot.slane %v796_v48, 1  ;;  %v815_v40 = vrot.slane %v814_v50, 1 }
 0x1b6   :  { %v848_v0 = vadd.f32 %v847_v17, %v846_v5  ;;  %v830_v6 = vadd.f32 %v829_v45, %v828_v60  ;;  %v798_v19 = vadd.f32 %v797_v3, %v796_v48  ;;  %v816_v10 = vadd.f32 %v815_v40, %v814_v50 }
 0x1b7   :  { %v656_v5 = vlaneseq }
 0x1b8   :  { %v849_v23 = vrot.slane %v848_v0, 2  ;;  %v831_v34 = vrot.slane %v830_v6, 2  ;;  %1501 = vpush %v798_v19 }
 0x1b9   :  { %1503 = vpush %v816_v10  ;;  %v2747_v60 = vand.u32 127, %v656_v5  ;;  %v1166_v5 = vld [vmem:[%s2842_s7] sm:$0x7] }
 0x1ba   :  { %v832_v41 = vadd.f32 %v831_v34, %v830_v6  ;;  %v850_v54 = vadd.f32 %v849_v23, %v848_v0  ;;  %1169 = vperm.xlu2 %1532, %v1166_v5  }
 0x1bb   :  { %v882_v26 = vpop.xlane.xlu2 %881  ;;  %v864_v20 = vpop.xlane.xlu1 %863  ;;  %vm658_vm2 = vcmp.eq.s32.totalorder %v2747_v60, 0  ;;  %vm677_vm3 = vcmp.eq.s32.totalorder %v2747_v60, 1  ;;  %vm695_vm4 = vcmp.eq.s32.totalorder %v2747_v60, 2  ;;  %vm713_vm5 = vcmp.eq.s32.totalorder %v2747_v60, 3 }
 0x1bc   :  { %v883_v25 = vrot.slane %v882_v26, 4  ;;  %v865_v22 = vrot.slane %v864_v20, 4  ;;  %v833_v31 = vrot.slane %v832_v41, 1  ;;  %v851_v56 = vrot.slane %v850_v54, 1 }
 0x1bd   :  { %vm731_vm6 = vcmp.eq.s32.totalorder %v2747_v60, 4  ;;  %vm749_vm7 = vcmp.eq.s32.totalorder %v2747_v60, 5  ;;  %vm767_vm8 = vcmp.eq.s32.totalorder %v2747_v60, 6  ;;  %vm785_vm10 = vcmp.eq.s32.totalorder %v2747_v60, 7 }
 0x1be   :  { %v884_v38 = vadd.f32 %v883_v25, %v882_v26  ;;  %v866_v21 = vadd.f32 %v865_v22, %v864_v20  ;;  %v834_v57 = vadd.f32 %v833_v31, %v832_v41  ;;  %v852_v11 = vadd.f32 %v851_v56, %v850_v54 }
 0x1bf   :  { %vm803_vm11 = vcmp.eq.s32.totalorder %v2747_v60, 8  ;;  %vm821_vm12 = vcmp.eq.s32.totalorder %v2747_v60, 9  ;;  %vm839_vm13 = vcmp.eq.s32.totalorder %v2747_v60, 10  ;;  %vm857_vm14 = vcmp.eq.s32.totalorder %v2747_v60, 11 }
 0x1c0   :  { %v885_v30 = vrot.slane %v884_v38, 2  ;;  %v867_v51 = vrot.slane %v866_v21, 2  ;;  %1505 = vpush %v834_v57  ;;  %vm875_vm15 = vcmp.eq.s32.totalorder %v2747_v60, 12  ;;  %vm893_vm0 = vcmp.eq.s32.totalorder %v2747_v60, 13 }
 0x1c1   :  { %1507 = vpush %v852_v11 }
 0x1c2   :  { %v868_v13 = vadd.f32 %v867_v51, %v866_v21  ;;  %v886_v61 = vadd.f32 %v885_v30, %v884_v38 }
 0x1c3   :  { %v918_v28 = vpop.xlane.xlu2 %917  ;;  %v900_v24 = vpop.xlane.xlu1 %899 }
 0x1c4   :  { %v919_v4 = vrot.slane %v918_v28, 4  ;;  %v901_v39 = vrot.slane %v900_v24, 4  ;;  %v869_v58 = vrot.slane %v868_v13, 1  ;;  %v887_v36 = vrot.slane %v886_v61, 1 }
 0x1c6   :  { %v920_v42 = vadd.f32 %v919_v4, %v918_v28  ;;  %v902_v49 = vadd.f32 %v901_v39, %v900_v24  ;;  %v870_v43 = vadd.f32 %v869_v58, %v868_v13  ;;  %v888_v9 = vadd.f32 %v887_v36, %v886_v61 }
 0x1c8   :  { %v921_v44 = vrot.slane %v920_v42, 2  ;;  %v903_v15 = vrot.slane %v902_v49, 2  ;;  %1509 = vpush %v870_v43 }
 0x1c9   :  { %1511 = vpush %v888_v9 }
 0x1ca   :  { %v904_v46 = vadd.f32 %v903_v15, %v902_v49  ;;  %v922_v53 = vadd.f32 %v921_v44, %v920_v42 }
 0x1cb   :  { %v1119_v47 = vpop.xlane.xlu1 %1118 }
 0x1cc   :  { %v1120_v35 = vrot.slane %v1119_v47, 4  ;;  %v905_v59 = vrot.slane %v904_v46, 1  ;;  %v923_v62 = vrot.slane %v922_v53, 1 }
 0x1ce   :  { %v1121_v33 = vadd.f32 %v1120_v35, %v1119_v47  ;;  %v906_v2 = vadd.f32 %v905_v59, %v904_v46  ;;  %v924_v14 = vadd.f32 %v923_v62, %v922_v53 }
 0x1d0   :  { %v1122_v16 = vrot.slane %v1121_v33, 2  ;;  %1513 = vpush %v906_v2 }
 0x1d1   :  { %1515 = vpush %v924_v14 }
 0x1d2   :  { %v1123_v8 = vadd.f32 %v1122_v16, %v1121_v33  ;;  %1517 = vpush %v942_v29  ;;  %s1488_s3 = spop %1487 }
 0x1d3   :  { %s1490_s5 = spop %1489  ;;  %v674_v17 = vstv %s1488_s3 }
 0x1d4   :  { %v1124_v48 = vrot.slane %v1123_v8, 1  ;;  %v692_v45 = vstv %s1490_s5  ;;  %v675_v40 = vsel %vm658_vm2, %v674_v17, 0.0  ;;  %v1144_v17 = vld [vmem:[#allocation7] sm:$0xff] }
 0x1d5   :  { %v693_v0 = vsel %vm677_vm3, %v692_v45, 0.0  ;;  %vm911_vm3 = vcmp.eq.s32.totalorder %v2747_v60, 14 }
 0x1d6   :  { %v1125_v50 = vadd.f32 %v1124_v48, %v1123_v8  ;;  %v694_v19 = vadd.f32 %v693_v0, %v675_v40  ;;  %v1155_v40 = vld [vmem:[%s2844_s9] sm:$0xff] }
 0x1d8   :  { %1519 = vpush %v1125_v50 }
 0x1d9   :  { %s1492_s19 = spop %1491 }
 0x1da   :  { %s1494_s20 = spop %1493  ;;  %v710_v3 = vstv %s1492_s19  ;;  %s1363_s19 = sshll.u32 %s2845_s10, 4  ;;  %s1364_s19 = int_to_ptr.hbm [resolvable:$true] %s1363_s19 }
 0x1db   :  { %s2743_s4 = spop %1495  ;;  %v711_v6 = vsel %vm695_vm4, %v710_v3, 0.0  ;;  %v728_v37 = vstv %s1494_s20  ;;  %vm929_vm4 = vcmp.eq.s32.totalorder %v2747_v60, 15  ;;  %s1741_s10 = smov [#allocation9]  }
 0x1dc   :  { %v712_v10 = vadd.f32 %v711_v6, %v694_v19  ;;  %v729_v23 = vsel %vm713_vm5, %v728_v37, 0.0  ;;  %v746_v41 = vstv %s2743_s4  ;;  %vm947_vm5 = vcmask 122880   ;;  %v1165_v37 = vld [vmem:[%s2841_s6] sm:$0x7]  ;;  %s1740_s6 = smov [#allocation8]   ;;  %s1372_s20 = sshll.u32 %s1741_s10, 4  ;;  %s1373_s20 = int_to_ptr.vmem [resolvable:$true] %s1372_s20 }
 0x1dd   :  { %v747_v27 = vsel %vm731_vm6, %v746_v41, 0.0  ;;  %vm1172_vm6 = vcmask 31744   ;;  %s1361_s9 = sshll.u32 %s1740_s6, 4  ;;  %s1362_s9 = int_to_ptr.vmem [resolvable:$true] %s1361_s9 }
 0x1de   :  { %v730_v34 = vadd.f32 %v729_v23, %v712_v10 }
 0x1e0   :  { %v748_v20 = vadd.f32 %v747_v27, %v730_v34 }
 0x1e1   :  { %s2745_s21 = spop %1497 }
 0x1e2   :  { %s2749_s22 = spop %1499  ;;  %v764_v54 = vstv %s2745_s21 }
 0x1e3   :  { %v765_v26 = vsel %vm749_vm7, %v764_v54, 0.0  ;;  %v782_v31 = vstv %s2749_s22  ;;  %s2855_s22 = sld [smem:[#allocation16_spill]] }
 0x1e4   :  { %v766_v22 = vadd.f32 %v765_v26, %v748_v20  ;;  %v783_v38 = vsel %vm767_vm8, %v782_v31, 0.0 }
 0x1e6   :  { %v784_v57 = vadd.f32 %v783_v38, %v766_v22 }
 0x1e9   :  { %s2751_s23 = spop %1501 }
 0x1ea   :  { %s2755_s24 = spop %1503  ;;  %v800_v56 = vstv %s2751_s23  ;;  %s1374_s23 = sshll.u32 %s2855_s22, 4  ;;  %s1375_s23 = int_to_ptr.hbm [resolvable:$true] %s1374_s23 }
 0x1eb   :  { %v801_v21 = vsel %vm785_vm10, %v800_v56, 0.0  ;;  %v818_v30 = vstv %s2755_s24  ;;  %s1742_s24 = smov [#allocation11]  }
 0x1ec   :  { %v802_v52 = vadd.f32 %v801_v21, %v784_v57  ;;  %v819_v61 = vsel %vm803_vm11, %v818_v30, 0.0 }
 0x1ee   :  { %v820_v24 = vadd.f32 %v819_v61, %v802_v52 }
 0x1f1   :  { %s2757_s25 = spop %1505 }
 0x1f2   :  { %s2760_s26 = spop %1507  ;;  %v836_v51 = vstv %s2757_s25  ;;  %s1383_s25 = sshll.u32 %s1742_s24, 4  ;;  %s1384_s25 = int_to_ptr.vmem [resolvable:$true] %s1383_s25 }
 0x1f3   :  { %v837_v7 = vsel %vm821_vm12, %v836_v51, 0.0  ;;  %v854_v58 = vstv %s2760_s26 }
 0x1f4   :  { %v838_v39 = vadd.f32 %v837_v7, %v820_v24  ;;  %v855_v49 = vsel %vm839_vm13, %v854_v58, 0.0 }
 0x1f6   :  { %v856_v18 = vadd.f32 %v855_v49, %v838_v39 }
 0x1f9   :  { %s2762_s27 = spop %1509 }
 0x1fa   :  { %s2764_s28 = spop %1511  ;;  %v872_v36 = vstv %s2762_s27 }
 0x1fb   :  { %v873_v43 = vsel %vm857_vm14, %v872_v36, 0.0  ;;  %v890_v44 = vstv %s2764_s28  ;;  %s2856_s28 = sld [smem:[#allocation17_spill]] }
 0x1fc   :  { %v874_v46 = vadd.f32 %v873_v43, %v856_v18  ;;  %v891_v62 = vsel %vm875_vm15, %v890_v44, 0.0 }
 0x1fe   :  { %v892_v33 = vadd.f32 %v891_v62, %v874_v46 }
 0x201   :  { %s2766_s29 = spop %1513 }
 0x202   :  { %s2769_s30 = spop %1515  ;;  %v908_v53 = vstv %s2766_s29  ;;  %s1385_s29 = sshll.u32 %s2856_s28, 4  ;;  %s1386_s29 = int_to_ptr.hbm [resolvable:$true] %s1385_s29 }
 0x203   :  { %s2772_s13 = spop %1517  ;;  %v909_v1 = vsel %vm893_vm0, %v908_v53, 0.0  ;;  %v926_v14 = vstv %s2769_s30 }
 0x204   :  { %v910_v2 = vadd.f32 %v909_v1, %v892_v33  ;;  %v927_v16 = vsel %vm911_vm3, %v926_v14, 0.0  ;;  %v944_v8 = vstv %s2772_s13 }
 0x205   :  { %v945_v48 = vsel %vm929_vm4, %v944_v8, 0.0 }
 0x206   :  { %v928_v29 = vadd.f32 %v927_v16, %v910_v2 }
 0x208   :  { %v946_v50 = vadd.f32 %v945_v48, %v928_v29 }
 0x209   :  { %s1520_s0 = spop %1519 }
 0x20a   :  { %s1127_s14 = smul.f32 0.0009765625, %s1520_s0  ;;  %948 = vst.msk [vmem:[#allocation11] sm:$0x1] %vm947_vm5, %v946_v50 }
 0x20c   :  { %s1129_s16 = smul.f32 %s1127_s14, %s2836_s1 }
 0x20e   :  { %v1130_v25 = vstv %s1129_s16 }
 0x20f   :  { %1601 = vrsqrt.f32 %v1130_v25  ;;  %vm1138_vm1 = vcmp.eq.f32.partialorder %v1130_v25, inf  ;;  %v1141_v47 = vand.u32 2147483648, %v1130_v25  ;;  %vm1140_vm2 = vcmp.eq.f32.partialorder %v1130_v25, 0.0 }
 0x215   :  { %v1602_v11 = vpop.eup %1601 }
 0x216   :  { %v1132_v13 = vmul.f32 %v1602_v11, %v1130_v25 }
 0x218   :  { %v1133_v28 = vmul.f32 %v1602_v11, %v1132_v13 }
 0x21a   :  { %v1134_v4 = vmul.f32 0.5, %v1133_v28 }
 0x21c   :  { %v1135_v42 = vsub.f32 1.5, %v1134_v4 }
 0x21e   :  { %v1136_v9 = vmul.f32 %v1602_v11, %v1135_v42 }
 0x220   :  { %v1137_v15 = vmul.f32 %v1136_v9, %v1130_v25 }
 0x222   :  { %v1139_v35 = vsel %vm1138_vm1, %v1130_v25, %v1137_v15 }
 0x223   :  { %v1142_v59 = vsel %vm1140_vm2, %v1141_v47, %v1139_v35 }
 0x224   :  { %1521 = vpush %v1142_v59 }
 0x255   :  { %s1522_s2 = spop %1521 }
 0x256   :  { %v1145_v45 = vstv %s1522_s2 }
 0x257   :  { %v1146_v3 = vmul.f32 %v1145_v45, %v1144_v17  ;;  %v1156_v60 = vmul.f32 %v1155_v40, %v1145_v45 }
 0x259   :  { %1148 = vst [vmem:[#allocation1] ss:$2 sm:$0xff] %v1146_v3 }
 0x260   :  { %v1149_v0 = vld.sshfl [vmem:[#allocation1] sm:$0xff pattern:$0x75316420]  ;;  %v1150_v6 = vld.sshfl [vmem:[#allocation1 + $0x8] sm:$0xff pattern:$0x75316420] }
 0x261   :  { %v1153_v19 = vadd.f32 %v1149_v0, %v2719_v63  ;;  %v1154_v10 = vadd.f32 %v1150_v6, %v2723_v55  ;;  %1158 = vst [vmem:[#allocation1] ss:$2 sm:$0xff] %v1156_v60  ;;  %v1170_v55 = vpop.permute.xlu2 %1169 }
 0x263   :  { %1475 = vmatpush.msk.msrb.mxu0 %vm661_vm9, %v1153_v19  ;;  %1477 = vmatpush.msk.msrb.mxu1 %vm661_vm9, %v1154_v10 }
 0x264   :  { %1478 = vmatmul.msk.f32.vlgmr.msrb.gmra.mxu1 %vm1172_vm6, %v1165_v37  ;;  %1476 = vmatmul.msk.f32.vlgmr.msrb.gmra.mxu0 %vm1172_vm6, %v1165_v37 }
 0x268   :  { %v1159_v23 = vld.sshfl [vmem:[#allocation1] sm:$0xff pattern:$0x75316420]  ;;  %v1160_v34 = vld.sshfl [vmem:[#allocation1 + $0x8] sm:$0xff pattern:$0x75316420] }
 0x269   :  { %v1163_v41 = vadd.f32 %v1159_v23, %v2726_v32  ;;  %v1164_v63 = vadd.f32 %v1160_v34, %v2729_v12 }
 0x26b   :  { %1479 = vmatpush.msk.msrb.mxu2 %vm661_vm9, %v1163_v41  ;;  %1481 = vmatpush.msk.msrb.mxu3 %vm661_vm9, %v1164_v63 }
 0x26c   :  { %1480 = vmatmul.msk.f32.vlgmr.msrb.gmra.mxu2 %vm1172_vm6, %v1165_v37  ;;  %1482 = vmatmul.msk.f32.vlgmr.msrb.gmra.mxu3 %vm1172_vm6, %v1165_v37 }
 0x2e1   :  { %v1219_v54 = vpop.f32.mrf.mxu1  ;;  %v1199_v27 = vpop.f32.mrf.mxu0 }
 0x2e2   :  { %v1220_v26 = vadd.f32 %v1219_v54, %v1170_v55  ;;  %v1200_v20 = vadd.f32 %v1199_v27, %v1170_v55 }
 0x2e4   :  { %v1484_v25 = vmul.f32 -1.442695, %v1220_v26  ;;  %v1483_v22 = vmul.f32 -1.442695, %v1200_v20 }
 0x2e6   :  { %1603 = vpow2.f32 %v1484_v25 }
 0x2e7   :  { %1605 = vpow2.f32 %v1483_v22 }
 0x2ec   :  { %v1604_v31 = vpop.eup %1603 }
 0x2ed   :  { %v1606_v56 = vpop.eup %1605  ;;  %v1275_v32 = vadd.f32 1.0, %v1604_v31 }
 0x2ee   :  { %v1274_v38 = vadd.f32 1.0, %v1606_v56 }
 0x2ef   :  { %1607 = vrcp.f32 %v1275_v32  ;;  %v1245_v12 = vpop.f32.mrf.mxu2  ;;  %v1265_v21 = vpop.f32.mrf.mxu3  ;;  %v1302_v24 = vand.u32 2147483648, %v1275_v32  ;;  %vm1296_vm7 = vweird.f32 %v1275_v32  ;;  %v1300_v39 = vand.u32 2147483647, %v1275_v32 }
 0x2f0   :  { %1609 = vrcp.f32 %v1274_v38  ;;  %v1246_v57 = vadd.f32 %v1245_v12, %v1170_v55  ;;  %v1266_v11 = vadd.f32 %v1265_v21, %v1170_v55  ;;  %vm1281_vm10 = vweird.f32 %v1274_v38 }
 0x2f1   :  { %v1287_v36 = vand.u32 2147483648, %v1274_v38  ;;  %v1285_v18 = vand.u32 2147483647, %v1274_v38  ;;  %v1303_v46 = vor.u32 1.1754944e-38, %v1302_v24  ;;  %vm1301_vm13 = vcmp.eq.f32.partialorder %v1300_v39, 8.507059e+37 }
 0x2f2   :  { %v1485_v52 = vmul.f32 -1.442695, %v1246_v57  ;;  %v1486_v30 = vmul.f32 -1.442695, %v1266_v11 }
 0x2f3   :  { %v1288_v53 = vor.u32 1.1754944e-38, %v1287_v36  ;;  %vm1286_vm15 = vcmp.eq.f32.partialorder %v1285_v18, 8.507059e+37 }
 0x2f4   :  { %1611 = vpow2.f32 %v1485_v52 }
 0x2f5   :  { %v1608_v51 = vpop.eup %1607  ;;  %1613 = vpow2.f32 %v1486_v30 }
 0x2f6   :  { %v1610_v13 = vpop.eup %1609  ;;  %v1292_v61 = vmul.f32 %v1608_v51, %v1275_v32  ;;  %vm1297_vm8 = vweird.f32 %v1608_v51 }
 0x2f7   :  { %v1277_v7 = vmul.f32 %v1610_v13, %v1274_v38  ;;  %vm1282_vm11 = vweird.f32 %v1610_v13  ;;  %vm1298_vm12 = vmor %vm1296_vm7, %vm1297_vm8 }
 0x2f8   :  { %v1293_v28 = vsub.f32 1.0, %v1292_v61  ;;  %vm1283_vm14 = vmor %vm1281_vm10, %vm1282_vm11 }
 0x2f9   :  { %v1278_v4 = vsub.f32 1.0, %v1277_v7 }
 0x2fa   :  { %v1612_v58 = vpop.eup %1611  ;;  %v1294_v42 = vmul.f32 %v1608_v51, %v1293_v28 }
 0x2fb   :  { %v1614_v49 = vpop.eup %1613  ;;  %v1318_v43 = vadd.f32 1.0, %v1612_v58  ;;  %v1279_v9 = vmul.f32 %v1610_v13, %v1278_v4 }
 0x2fc   :  { %v1319_v44 = vadd.f32 1.0, %v1614_v49  ;;  %v1295_v15 = vadd.f32 %v1608_v51, %v1294_v42 }
 0x2fd   :  { %1615 = vrcp.f32 %v1318_v43  ;;  %v1280_v47 = vadd.f32 %v1610_v13, %v1279_v9  ;;  %vm1325_vm2 = vweird.f32 %v1318_v43  ;;  %v1331_v60 = vand.u32 2147483648, %v1318_v43 }
 0x2fe   :  { %1617 = vrcp.f32 %v1319_v44  ;;  %v1299_v35 = vsel %vm1298_vm12, %v1608_v51, %v1295_v15  ;;  %v1346_v17 = vand.u32 2147483648, %v1319_v44  ;;  %v1344_v3 = vand.u32 2147483647, %v1319_v44 }
 0x2ff   :  { %v1304_v59 = vsel %vm1301_vm13, %v1303_v46, %v1299_v35  ;;  %v1284_v62 = vsel %vm1283_vm14, %v1610_v13, %v1280_v47  ;;  %v1329_v6 = vand.u32 2147483647, %v1318_v43  ;;  %vm1340_vm4 = vweird.f32 %v1319_v44 }
 0x300   :  { %v1308_v1 = vrot.slane %v1304_v59, 4  ;;  %v1289_v33 = vsel %vm1286_vm15, %v1288_v53, %v1284_v62  ;;  %v1347_v10 = vor.u32 1.1754944e-38, %v1346_v17  ;;  %vm1345_vm6 = vcmp.eq.f32.partialorder %v1344_v3, 8.507059e+37 }
 0x301   :  { %v1332_v34 = vor.u32 1.1754944e-38, %v1331_v60  ;;  %vm1330_vm7 = vcmp.eq.f32.partialorder %v1329_v6, 8.507059e+37 }
 0x302   :  { %v1309_v14 = vsel %vm661_vm9, %v1289_v33, %v1308_v1 }
 0x303   :  { %v1616_v2 = vpop.eup %1615  ;;  %1311 = vst [vmem:[#allocation8] sm:$0x77] %v1309_v14 }
 0x304   :  { %v1618_v16 = vpop.eup %1617  ;;  %v1321_v29 = vmul.f32 %v1616_v2, %v1318_v43  ;;  %1366 = dma.vmem_to_hbm [thread:$0]  %s1362_s9, 128, %s1364_s19, [#allocation5]   ;;  %vm1326_vm0 = vweird.f32 %v1616_v2 }
 0x305   :  { %v1336_v8 = vmul.f32 %v1618_v16, %v1319_v44  ;;  %vm1341_vm1 = vweird.f32 %v1618_v16  ;;  %vm2822_vm3 = vmor %vm1325_vm2, %vm1326_vm0 }
 0x306   :  { %v1322_v48 = vsub.f32 1.0, %v1321_v29  ;;  %vm1342_vm5 = vmor %vm1340_vm4, %vm1341_vm1 }
 0x307   :  { %v1337_v50 = vsub.f32 1.0, %v1336_v8 }
 0x308   :  { %v1323_v5 = vmul.f32 %v1616_v2, %v1322_v48 }
 0x309   :  { %v1338_v45 = vmul.f32 %v1618_v16, %v1337_v50 }
 0x30a   :  { %v1324_v40 = vadd.f32 %v1616_v2, %v1323_v5 }
 0x30b   :  { %v1339_v19 = vadd.f32 %v1618_v16, %v1338_v45 }
 0x30c   :  { %v1328_v37 = vsel %vm2822_vm3, %v1616_v2, %v1324_v40 }
 0x30d   :  { %v1343_v23 = vsel %vm1342_vm5, %v1618_v16, %v1339_v19  ;;  %v1333_v55 = vsel %vm1330_vm7, %v1332_v34, %v1328_v37 }
 0x30e   :  { %v1348_v41 = vsel %vm1345_vm6, %v1347_v10, %v1343_v23 }
 0x30f   :  { %v1352_v63 = vrot.slane %v1348_v41, 4 }
 0x311   :  { %v1353_v54 = vsel %vm661_vm9, %v1333_v55, %v1352_v63 }
 0x312   :  { %1355 = vst [vmem:[#allocation9] sm:$0x77] %v1353_v54 }
 0x313   :  { %1377 = dma.vmem_to_hbm [thread:$0]  %s1373_s20, 128, %s1375_s23, [#allocation10]  }
 0x314   :  { %1388 = dma.vmem_to_hbm [thread:$0]  %s1384_s25, 16, %s1386_s29, [#allocation10]  }
 0x315   :  { %1731 = dma.done.wait [#allocation5], 128  }
 0x316   :  { %1732 = vsyncadd [#allocation5], 4294967168 }
 0x317   :  { %1733 = dma.done.wait [#allocation10], 144  }
 0x318   :  { %1734 = vsyncadd [#allocation10], 4294967152 }
 0x319   :  { %1401 = vsyncpa [#allocation4], 1 }
 0x31a   :  { %1402 = vsyncpa [#allocation5], 1 }
 0x31b   :  { %1403 = vsyncpa [#allocation10], 1 }
 0x31c   :  { %1404 = vsyncpa [#allocation6], 1 }

</bundles_post_ra>
